<compile_context>
chip_gen: v5e
topology: v5e:2x2
jax: 0.10.0
libtpu: 0.0.40
codegen_flags: <defaults>
</compile_context>

<pallas_src>
import functools

import jax
import jax.numpy as jnp
from jax import lax
from jax.experimental import pallas as pl
from jax.experimental.pallas import tpu as pltpu


# ----------------------------- Pallas kernel --------------------------------

def _bottleneck_kernel(Wp, TH, x_ref, m_ref, w1_ref, b1_ref, w2_ref, b2_ref,
                       w3_ref, b3_ref, o_ref):
    """Fused bottleneck block on one (row-tile, batch-image) slab.

    x_ref : ((TH+3)*Wp, Cin) f32  -- spatially padded, row-haloed input slab
    m_ref : ((TH+3)*Wp, 1)   f32  -- 1.0 on real pixels, 0.0 on padding ring
    w*_ref: bf16 weights with BN scale (and Sensity mask) folded into columns
    b*_ref: f32 biases with BN bias (and Sensity mask) folded in
    o_ref : (TH*Wp, Cout)    f32  -- output slab (garbage in last 2 columns,
                                     sliced off by the wrapper)
    """
    M2 = TH * Wp
    C2 = w2_ref.shape[2]

    xv = x_ref[...]                                            # f32 slab

    # --- conv1 (1x1) + bn1 + relu + Sensity mask (folded) -------------------
    # Computed for the whole haloed slab so conv2's halo rows are in VMEM.
    h1 = jnp.dot(xv.astype(jnp.bfloat16), w1_ref[...],
                 preferred_element_type=jnp.float32)
    h1 = jnp.maximum(h1 + b1_ref[...], 0.0)
    h1 = h1 * m_ref[...]          # enforce zeros at the spatial-padding ring

    # --- conv2 (3x3, pad=1, stride=1) + bn2 + relu + Sensity mask (folded) ---
    # Tap (dh, dw) of the 3x3 conv is a flat shift of dh*Wp + dw rows of the
    # padded slab: 9 shifted matmuls accumulated in f32.
    acc = jnp.zeros((M2, C2), jnp.float32)
    for k in range(9):
        off = (k // 3) * Wp + (k % 3)
        tap = h1[off:off + M2, :].astype(jnp.bfloat16)
        acc = acc + jnp.dot(tap, w2_ref[k], preferred_element_type=jnp.float32)
    h2 = jnp.maximum(acc + b2_ref[...], 0.0)

    # --- conv3 (1x1) + bn3 + residual + relu --------------------------------
    res = xv[Wp + 1:Wp + 1 + M2, :]                            # exact f32 residual
    y = jnp.dot(h2.astype(jnp.bfloat16), w3_ref[...],
                preferred_element_type=jnp.float32)
    y = y + b3_ref[...] + res
    o_ref[...] = jnp.maximum(y, 0.0).astype(o_ref.dtype)


# ------------------------------- JAX glue ------------------------------------

def bn_fold(gamma, beta, mean, var, eps=1e-5):
    s = gamma / jnp.sqrt(var + eps)
    return s, beta - mean * s


def _pick_tile_h(H, W, cin, c1, c2, cout, budget_bytes=6 << 20):
    """Largest divisor of H whose double-buffered working set fits the budget
    (kept well under the default 32 MiB scoped VMEM limit and v7x's 64 MiB)."""
    Wp = W + 2
    best = 1
    for th in range(1, H + 1):
        if H % th:
            continue
        m1, m2 = (th + 3) * Wp, th * Wp
        streamed = 2 * (m1 * cin + m2 * cout + m1) * 4   # x / out / mask, dbl-buffered
        resident = (m1 * c1 + m2 * c2) * 4               # in-kernel intermediates
        if streamed + resident <= budget_bytes:
            best = th
    return best


def bottleneck_sensity_forward(x_nchw, p, stride=1, tile_h=None):
    """Inference forward of Bottleneck_Sensity (stride=1, downsample=None)."""
    assert stride == 1, "only stride=1 / downsample=None is supported"
    N, C_in, H, W = x_nchw.shape
    C1 = p["conv1_w"].shape[0]
    C2 = p["conv2_w"].shape[0]
    C_out = p["conv3_w"].shape[0]
    assert C_out == C_in, "identity residual requires C_out == C_in"

    Wp = W + 2
    TH = tile_h if tile_h is not None else _pick_tile_h(H, W, C_in, C1, C2, C_out)
    assert H % TH == 0, "tile_h must divide H"
    T = H // TH
    M1 = (TH + 3) * Wp
    M2 = TH * Wp

    # ---- fold BN (+ Sensity channel mask, mask >= 0) into weights / biases ----
    s1, b1 = bn_fold(p["bn1_g"], p["bn1_b"], p["bn1_m"], p["bn1_v"])
    s2, b2 = bn_fold(p["bn2_g"], p["bn2_b"], p["bn2_m"], p["bn2_v"])
    s3, b3 = bn_fold(p["bn3_g"], p["bn3_b"], p["bn3_m"], p["bn3_v"])
    m1v, m2v = p["mask1"], p["mask2"]
    # TODO(synk): at inference the masks are static; mask==0 channels could
    # additionally be pruned out of w1/w2/w3 to shrink the matmuls further.
    w1f = (jnp.transpose(p["conv1_w"][:, :, 0, 0], (1, 0))
           * (s1 * m1v)[None, :]).astype(jnp.bfloat16)            # (Cin, C1)
    b1f = (b1 * m1v).reshape(1, C1).astype(jnp.float32)
    w2f = (jnp.transpose(p["conv2_w"], (2, 3, 1, 0)).reshape(9, C1, C2)
           * (s2 * m2v)[None, None, :]).astype(jnp.bfloat16)      # (9, C1, C2)
    b2f = (b2 * m2v).reshape(1, C2).astype(jnp.float32)
    w3f = (jnp.transpose(p["conv3_w"][:, :, 0, 0], (1, 0))
           * s3[None, :]).astype(jnp.bfloat16)                    # (C2, Cout)
    b3f = b3.reshape(1, C_out).astype(jnp.float32)

    # ---- row-haloed, spatially padded input slabs (plain-JAX glue) ----------
    x = jnp.transpose(x_nchw, (0, 2, 3, 1)).astype(jnp.float32)   # NHWC
    xp = jnp.pad(x, ((0, 0), (1, 2), (1, 1), (0, 0)))             # (N, H+3, Wp, Cin)
    x_tiles = jnp.stack([xp[:, t * TH:t * TH + TH + 3] for t in range(T)], axis=1)
    x_tiles = x_tiles.reshape(N, T, M1, C_in)

    # validity mask: 1.0 on real image pixels of the padded slab, 0.0 on the
    # zero-padding ring / extra junk row (enforces conv2's zero padding).
    r = jnp.arange(TH + 3)[None, :, None]
    c = jnp.arange(Wp)[None, None, :]
    g = jnp.arange(T)[:, None, None] * TH + r
    vmask = ((g >= 1) & (g <= H) & (c >= 1) & (c <= W)).astype(jnp.float32)
    vmask = vmask.reshape(T, M1, 1)

    flops = 2 * N * T * (M1 * C_in * C1 + 9 * M2 * C1 * C2 + M2 * C2 * C_out)
    bytes_accessed = (x_tiles.size * 4 + N * T * M2 * C_out * 4 + vmask.size * 4
                      + (w1f.size + w2f.size + w3f.size) * 2
                      + (b1f.size + b2f.size + b3f.size) * 4)

    out = pl.pallas_call(
        functools.partial(_bottleneck_kernel, Wp, TH),
        out_shape=jax.ShapeDtypeStruct((N, T, M2, C_out), jnp.float32),
        grid=(N, T),
        in_specs=[
            pl.BlockSpec((None, None, M1, C_in), lambda n, t: (n, t, 0, 0)),
            pl.BlockSpec((None, M1, 1), lambda n, t: (t, 0, 0)),
            # weights / biases: constant index_map -> stay VMEM-resident
            pl.BlockSpec((C_in, C1), lambda n, t: (0, 0)),
            pl.BlockSpec((1, C1), lambda n, t: (0, 0)),
            pl.BlockSpec((9, C1, C2), lambda n, t: (0, 0, 0)),
            pl.BlockSpec((1, C2), lambda n, t: (0, 0)),
            pl.BlockSpec((C2, C_out), lambda n, t: (0, 0)),
            pl.BlockSpec((1, C_out), lambda n, t: (0, 0)),
        ],
        out_specs=pl.BlockSpec((None, None, M2, C_out), lambda n, t: (n, t, 0, 0)),
        compiler_params=pltpu.CompilerParams(
            dimension_semantics=("parallel", "parallel")),
        cost_estimate=pl.CostEstimate(flops=flops, transcendentals=0,
                                      bytes_accessed=bytes_accessed),
    )(x_tiles, vmask, w1f, b1f, w2f, b2f, w3f, b3f)

    out = out.reshape(N, T, TH, Wp, C_out)[:, :, :, :W, :]        # drop pad cols
    out = out.reshape(N, H, W, C_out)
    return jnp.transpose(out, (0, 3, 1, 2))                       # back to NCHW


# ---------------------------- pure-JAX reference -----------------------------

def _conv(x, w, stride=1, pad=0):
    return lax.conv_general_dilated(x, w, (stride, stride), [(pad, pad)] * 2,
                                    dimension_numbers=("NCHW", "OIHW", "NCHW"))


def reference_forward(x, p, stride=1):
    def bn(y, g, b, m, v):
        s, bi = bn_fold(g, b, m, v)
        return y * s.reshape(1, -1, 1, 1) + bi.reshape(1, -1, 1, 1)

    out = jnp.maximum(bn(_conv(x, p["conv1_w"]),
                         p["bn1_g"], p["bn1_b"], p["bn1_m"], p["bn1_v"]), 0.0)
    out = out * p["mask1"].reshape(1, -1, 1, 1)
    out = jnp.maximum(bn(_conv(out, p["conv2_w"], stride, 1),
                         p["bn2_g"], p["bn2_b"], p["bn2_m"], p["bn2_v"]), 0.0)
    out = out * p["mask2"].reshape(1, -1, 1, 1)
    out = bn(_conv(out, p["conv3_w"]),
             p["bn3_g"], p["bn3_b"], p["bn3_m"], p["bn3_v"])
    return jnp.maximum(out + x, 0.0)


# --------------------------------- main ---------------------------------------

if __name__ == "__main__":
    key = jax.random.PRNGKey(0)
    # number_list = [C_mid1, C_in, C_mid2, C_mid1, C_out(=C_in), C_mid2]
    N, C_in, H, W = 2, 16, 16, 16
    C_mid1, C_mid2, C_out = 8, 8, C_in
    stride = 1
    beta1, beta2 = 1.0, 1.0

    ks = jax.random.split(key, 16)
    p = {
        "conv1_w": jax.random.normal(ks[0], (C_mid1, C_in, 1, 1), jnp.float32) * 0.2,
        "conv2_w": jax.random.normal(ks[1], (C_mid2, C_mid1, 3, 3), jnp.float32) * 0.1,
        "conv3_w": jax.random.normal(ks[2], (C_out, C_mid2, 1, 1), jnp.float32) * 0.2,
        "bn1_g": jax.random.uniform(ks[3], (C_mid1,), jnp.float32, 0.5, 1.5),
        "bn1_b": jax.random.normal(ks[4], (C_mid1,), jnp.float32) * 0.1,
        "bn1_m": jax.random.normal(ks[5], (C_mid1,), jnp.float32) * 0.1,
        "bn1_v": jax.random.uniform(ks[6], (C_mid1,), jnp.float32, 0.5, 1.5),
        "bn2_g": jax.random.uniform(ks[7], (C_mid2,), jnp.float32, 0.5, 1.5),
        "bn2_b": jax.random.normal(ks[8], (C_mid2,), jnp.float32) * 0.1,
        "bn2_m": jax.random.normal(ks[9], (C_mid2,), jnp.float32) * 0.1,
        "bn2_v": jax.random.uniform(ks[10], (C_mid2,), jnp.float32, 0.5, 1.5),
        "bn3_g": jax.random.uniform(ks[11], (C_out,), jnp.float32, 0.5, 1.5),
        "bn3_b": jax.random.normal(ks[12], (C_out,), jnp.float32) * 0.1,
        "bn3_m": jax.random.normal(ks[13], (C_out,), jnp.float32) * 0.1,
        "bn3_v": jax.random.uniform(ks[14], (C_out,), jnp.float32, 0.5, 1.5),
    }
    # Sensity_Filter inference masks: keep a channel subset, scale kept channels
    # by beta (beta1 = beta2 = 1.0 as in the module).
    # TODO(synk): Sensity_Filter.Use_Sensity source is unavailable; modeled as a
    # per-channel keep/drop mask applied after ReLU (channel_index = kept channels).
    keep1 = jnp.arange(0, C_mid1, 2)
    keep2 = jnp.arange(1, C_mid2, 2)
    p["mask1"] = jnp.zeros((C_mid1,), jnp.float32).at[keep1].set(beta1)
    p["mask2"] = jnp.zeros((C_mid2,), jnp.float32).at[keep2].set(beta2)

    x = jax.random.normal(ks[15], (N, C_in, H, W), jnp.float32)

    # tile_h=8 -> 2 row tiles per image: exercises the halo / boundary-mask path.
    out = bottleneck_sensity_forward(x, p, stride=stride, tile_h=8)
    out = jax.block_until_ready(out)

    ref = reference_forward(x, p, stride=stride)
    assert out.shape == ref.shape == (N, C_out, H, W)
    # Kernel uses bf16 MXU operands (per perf review) vs. the f32 reference;
    # bf16 noise stays far below this tolerance, structural bugs would be O(1).
    assert jnp.allclose(out, ref, atol=1e-1, rtol=1e-1), "mismatch vs. JAX reference"

    print("KERNEL_OK")
</pallas_src>

<mosaic_0001>
module attributes {stable_mosaic.version = 11 : i64} {
  func.func @_bottleneck_kernel(%arg0: i32, %arg1: i32, %arg2: memref<1x1x198x16xf32, #tpu.memory_space<vmem>>, %arg3: memref<1x198x1xf32, #tpu.memory_space<vmem>>, %arg4: memref<16x8xbf16, #tpu.memory_space<vmem>>, %arg5: memref<1x8xf32, #tpu.memory_space<vmem>>, %arg6: memref<9x8x8xbf16, #tpu.memory_space<vmem>>, %arg7: memref<1x8xf32, #tpu.memory_space<vmem>>, %arg8: memref<8x16xbf16, #tpu.memory_space<vmem>>, %arg9: memref<1x16xf32, #tpu.memory_space<vmem>>, %arg10: memref<1x1x144x16xf32, #tpu.memory_space<vmem>>) attributes {dimension_semantics = [#tpu.dimension_semantics<parallel>, #tpu.dimension_semantics<parallel>], iteration_bounds = array<i64: 2, 2>, scalar_prefetch = 0 : i64, scratch_operands = 0 : i64, tpu.core_type = #tpu.core_type<tc>, window_params = [{transform_indices = @transform_0, window_bounds = array<i64: 1, 1, 198, 16>}, {transform_indices = @transform_1, window_bounds = array<i64: 1, 198, 1>}, {pipeline_mode = #tpu.pipeline_mode<synchronous>, transform_indices = @transform_2, window_bounds = array<i64: 16, 8>}, {pipeline_mode = #tpu.pipeline_mode<synchronous>, transform_indices = @transform_3, window_bounds = array<i64: 1, 8>}, {pipeline_mode = #tpu.pipeline_mode<synchronous>, transform_indices = @transform_4, window_bounds = array<i64: 9, 8, 8>}, {pipeline_mode = #tpu.pipeline_mode<synchronous>, transform_indices = @transform_5, window_bounds = array<i64: 1, 8>}, {pipeline_mode = #tpu.pipeline_mode<synchronous>, transform_indices = @transform_6, window_bounds = array<i64: 8, 16>}, {pipeline_mode = #tpu.pipeline_mode<synchronous>, transform_indices = @transform_7, window_bounds = array<i64: 1, 16>}, {transform_indices = @transform_8, window_bounds = array<i64: 1, 1, 144, 16>}]} {
    %c0 = arith.constant 0 : index
    %c0_0 = arith.constant 0 : index
    %c0_1 = arith.constant 0 : index
    %c0_2 = arith.constant 0 : index
    %0 = vector.load %arg2[%c0, %c0_0, %c0_1, %c0_2] : memref<1x1x198x16xf32, #tpu.memory_space<vmem>>, vector<1x1x198x16xf32>
    %1 = vector.shape_cast %0 : vector<1x1x198x16xf32> to vector<198x16xf32>
    %2 = arith.truncf %1 : vector<198x16xf32> to vector<198x16xbf16>
    %c0_3 = arith.constant 0 : index
    %c0_4 = arith.constant 0 : index
    %3 = vector.load %arg4[%c0_3, %c0_4] : memref<16x8xbf16, #tpu.memory_space<vmem>>, vector<16x8xbf16>
    %cst = arith.constant dense<0.000000e+00> : vector<198x8xf32>
    %4 = tpu.matmul %2, %3, %cst {dimension_numbers = #tpu.dot_dimension_numbers<[1], [0], [0], [1], [0, 0, 1, 1], [], []>} : vector<198x16xbf16>, vector<16x8xbf16>, vector<198x8xf32> -> vector<198x8xf32>
    %c0_5 = arith.constant 0 : index
    %c0_6 = arith.constant 0 : index
    %5 = vector.load %arg5[%c0_5, %c0_6] : memref<1x8xf32, #tpu.memory_space<vmem>>, vector<1x8xf32>
    %6 = vector.broadcast %5 : vector<1x8xf32> to vector<198x8xf32>
    %7 = arith.addf %4, %6 : vector<198x8xf32>
    %cst_7 = arith.constant 0.000000e+00 : f32
    %8 = vector.broadcast %cst_7 : f32 to vector<198x8xf32>
    %9 = arith.maximumf %7, %8 : vector<198x8xf32>
    %c0_8 = arith.constant 0 : index
    %c0_9 = arith.constant 0 : index
    %c0_10 = arith.constant 0 : index
    %10 = vector.load %arg3[%c0_8, %c0_9, %c0_10] : memref<1x198x1xf32, #tpu.memory_space<vmem>>, vector<1x198x1xf32>
    %11 = vector.shape_cast %10 : vector<1x198x1xf32> to vector<198x1xf32>
    %12 = vector.broadcast %11 : vector<198x1xf32> to vector<198x8xf32>
    %13 = arith.mulf %9, %12 : vector<198x8xf32>
    %cst_11 = arith.constant 0.000000e+00 : f32
    %14 = vector.broadcast %cst_11 : f32 to vector<144x8xf32>
    %15 = vector.extract_strided_slice %13 {offsets = [0, 0], sizes = [144, 8], strides = [1, 1]} : vector<198x8xf32> to vector<144x8xf32>
    %16 = arith.truncf %15 : vector<144x8xf32> to vector<144x8xbf16>
    %c0_12 = arith.constant 0 : index
    %c0_13 = arith.constant 0 : index
    %c0_14 = arith.constant 0 : index
    %17 = vector.load %arg6[%c0_12, %c0_13, %c0_14] : memref<9x8x8xbf16, #tpu.memory_space<vmem>>, vector<1x8x8xbf16>
    %18 = vector.shape_cast %17 : vector<1x8x8xbf16> to vector<8x8xbf16>
    %cst_15 = arith.constant dense<0.000000e+00> : vector<144x8xf32>
    %19 = tpu.matmul %16, %18, %cst_15 {dimension_numbers = #tpu.dot_dimension_numbers<[1], [0], [0], [1], [0, 0, 1, 1], [], []>} : vector<144x8xbf16>, vector<8x8xbf16>, vector<144x8xf32> -> vector<144x8xf32>
    %20 = arith.addf %14, %19 : vector<144x8xf32>
    %21 = vector.extract_strided_slice %13 {offsets = [1, 0], sizes = [144, 8], strides = [1, 1]} : vector<198x8xf32> to vector<144x8xf32>
    %22 = arith.truncf %21 : vector<144x8xf32> to vector<144x8xbf16>
    %c1 = arith.constant 1 : index
    %c0_16 = arith.constant 0 : index
    %c0_17 = arith.constant 0 : index
    %23 = vector.load %arg6[%c1, %c0_16, %c0_17] : memref<9x8x8xbf16, #tpu.memory_space<vmem>>, vector<1x8x8xbf16>
    %24 = vector.shape_cast %23 : vector<1x8x8xbf16> to vector<8x8xbf16>
    %cst_18 = arith.constant dense<0.000000e+00> : vector<144x8xf32>
    %25 = tpu.matmul %22, %24, %cst_18 {dimension_numbers = #tpu.dot_dimension_numbers<[1], [0], [0], [1], [0, 0, 1, 1], [], []>} : vector<144x8xbf16>, vector<8x8xbf16>, vector<144x8xf32> -> vector<144x8xf32>
    %26 = arith.addf %20, %25 : vector<144x8xf32>
    %27 = vector.extract_strided_slice %13 {offsets = [2, 0], sizes = [144, 8], strides = [1, 1]} : vector<198x8xf32> to vector<144x8xf32>
    %28 = arith.truncf %27 : vector<144x8xf32> to vector<144x8xbf16>
    %c2 = arith.constant 2 : index
    %c0_19 = arith.constant 0 : index
    %c0_20 = arith.constant 0 : index
    %29 = vector.load %arg6[%c2, %c0_19, %c0_20] : memref<9x8x8xbf16, #tpu.memory_space<vmem>>, vector<1x8x8xbf16>
    %30 = vector.shape_cast %29 : vector<1x8x8xbf16> to vector<8x8xbf16>
    %cst_21 = arith.constant dense<0.000000e+00> : vector<144x8xf32>
    %31 = tpu.matmul %28, %30, %cst_21 {dimension_numbers = #tpu.dot_dimension_numbers<[1], [0], [0], [1], [0, 0, 1, 1], [], []>} : vector<144x8xbf16>, vector<8x8xbf16>, vector<144x8xf32> -> vector<144x8xf32>
    %32 = arith.addf %26, %31 : vector<144x8xf32>
    %33 = vector.extract_strided_slice %13 {offsets = [18, 0], sizes = [144, 8], strides = [1, 1]} : vector<198x8xf32> to vector<144x8xf32>
    %34 = arith.truncf %33 : vector<144x8xf32> to vector<144x8xbf16>
    %c3 = arith.constant 3 : index
    %c0_22 = arith.constant 0 : index
    %c0_23 = arith.constant 0 : index
    %35 = vector.load %arg6[%c3, %c0_22, %c0_23] : memref<9x8x8xbf16, #tpu.memory_space<vmem>>, vector<1x8x8xbf16>
    %36 = vector.shape_cast %35 : vector<1x8x8xbf16> to vector<8x8xbf16>
    %cst_24 = arith.constant dense<0.000000e+00> : vector<144x8xf32>
    %37 = tpu.matmul %34, %36, %cst_24 {dimension_numbers = #tpu.dot_dimension_numbers<[1], [0], [0], [1], [0, 0, 1, 1], [], []>} : vector<144x8xbf16>, vector<8x8xbf16>, vector<144x8xf32> -> vector<144x8xf32>
    %38 = arith.addf %32, %37 : vector<144x8xf32>
    %39 = vector.extract_strided_slice %13 {offsets = [19, 0], sizes = [144, 8], strides = [1, 1]} : vector<198x8xf32> to vector<144x8xf32>
    %40 = arith.truncf %39 : vector<144x8xf32> to vector<144x8xbf16>
    %c4 = arith.constant 4 : index
    %c0_25 = arith.constant 0 : index
    %c0_26 = arith.constant 0 : index
    %41 = vector.load %arg6[%c4, %c0_25, %c0_26] : memref<9x8x8xbf16, #tpu.memory_space<vmem>>, vector<1x8x8xbf16>
    %42 = vector.shape_cast %41 : vector<1x8x8xbf16> to vector<8x8xbf16>
    %cst_27 = arith.constant dense<0.000000e+00> : vector<144x8xf32>
    %43 = tpu.matmul %40, %42, %cst_27 {dimension_numbers = #tpu.dot_dimension_numbers<[1], [0], [0], [1], [0, 0, 1, 1], [], []>} : vector<144x8xbf16>, vector<8x8xbf16>, vector<144x8xf32> -> vector<144x8xf32>
    %44 = arith.addf %38, %43 : vector<144x8xf32>
    %45 = vector.extract_strided_slice %13 {offsets = [20, 0], sizes = [144, 8], strides = [1, 1]} : vector<198x8xf32> to vector<144x8xf32>
    %46 = arith.truncf %45 : vector<144x8xf32> to vector<144x8xbf16>
    %c5 = arith.constant 5 : index
    %c0_28 = arith.constant 0 : index
    %c0_29 = arith.constant 0 : index
    %47 = vector.load %arg6[%c5, %c0_28, %c0_29] : memref<9x8x8xbf16, #tpu.memory_space<vmem>>, vector<1x8x8xbf16>
    %48 = vector.shape_cast %47 : vector<1x8x8xbf16> to vector<8x8xbf16>
    %cst_30 = arith.constant dense<0.000000e+00> : vector<144x8xf32>
    %49 = tpu.matmul %46, %48, %cst_30 {dimension_numbers = #tpu.dot_dimension_numbers<[1], [0], [0], [1], [0, 0, 1, 1], [], []>} : vector<144x8xbf16>, vector<8x8xbf16>, vector<144x8xf32> -> vector<144x8xf32>
    %50 = arith.addf %44, %49 : vector<144x8xf32>
    %51 = vector.extract_strided_slice %13 {offsets = [36, 0], sizes = [144, 8], strides = [1, 1]} : vector<198x8xf32> to vector<144x8xf32>
    %52 = arith.truncf %51 : vector<144x8xf32> to vector<144x8xbf16>
    %c6 = arith.constant 6 : index
    %c0_31 = arith.constant 0 : index
    %c0_32 = arith.constant 0 : index
    %53 = vector.load %arg6[%c6, %c0_31, %c0_32] : memref<9x8x8xbf16, #tpu.memory_space<vmem>>, vector<1x8x8xbf16>
    %54 = vector.shape_cast %53 : vector<1x8x8xbf16> to vector<8x8xbf16>
    %cst_33 = arith.constant dense<0.000000e+00> : vector<144x8xf32>
    %55 = tpu.matmul %52, %54, %cst_33 {dimension_numbers = #tpu.dot_dimension_numbers<[1], [0], [0], [1], [0, 0, 1, 1], [], []>} : vector<144x8xbf16>, vector<8x8xbf16>, vector<144x8xf32> -> vector<144x8xf32>
    %56 = arith.addf %50, %55 : vector<144x8xf32>
    %57 = vector.extract_strided_slice %13 {offsets = [37, 0], sizes = [144, 8], strides = [1, 1]} : vector<198x8xf32> to vector<144x8xf32>
    %58 = arith.truncf %57 : vector<144x8xf32> to vector<144x8xbf16>
    %c7 = arith.constant 7 : index
    %c0_34 = arith.constant 0 : index
    %c0_35 = arith.constant 0 : index
    %59 = vector.load %arg6[%c7, %c0_34, %c0_35] : memref<9x8x8xbf16, #tpu.memory_space<vmem>>, vector<1x8x8xbf16>
    %60 = vector.shape_cast %59 : vector<1x8x8xbf16> to vector<8x8xbf16>
    %cst_36 = arith.constant dense<0.000000e+00> : vector<144x8xf32>
    %61 = tpu.matmul %58, %60, %cst_36 {dimension_numbers = #tpu.dot_dimension_numbers<[1], [0], [0], [1], [0, 0, 1, 1], [], []>} : vector<144x8xbf16>, vector<8x8xbf16>, vector<144x8xf32> -> vector<144x8xf32>
    %62 = arith.addf %56, %61 : vector<144x8xf32>
    %63 = vector.extract_strided_slice %13 {offsets = [38, 0], sizes = [144, 8], strides = [1, 1]} : vector<198x8xf32> to vector<144x8xf32>
    %64 = arith.truncf %63 : vector<144x8xf32> to vector<144x8xbf16>
    %c8 = arith.constant 8 : index
    %c0_37 = arith.constant 0 : index
    %c0_38 = arith.constant 0 : index
    %65 = vector.load %arg6[%c8, %c0_37, %c0_38] : memref<9x8x8xbf16, #tpu.memory_space<vmem>>, vector<1x8x8xbf16>
    %66 = vector.shape_cast %65 : vector<1x8x8xbf16> to vector<8x8xbf16>
    %cst_39 = arith.constant dense<0.000000e+00> : vector<144x8xf32>
    %67 = tpu.matmul %64, %66, %cst_39 {dimension_numbers = #tpu.dot_dimension_numbers<[1], [0], [0], [1], [0, 0, 1, 1], [], []>} : vector<144x8xbf16>, vector<8x8xbf16>, vector<144x8xf32> -> vector<144x8xf32>
    %68 = arith.addf %62, %67 : vector<144x8xf32>
    %c0_40 = arith.constant 0 : index
    %c0_41 = arith.constant 0 : index
    %69 = vector.load %arg7[%c0_40, %c0_41] : memref<1x8xf32, #tpu.memory_space<vmem>>, vector<1x8xf32>
    %70 = vector.broadcast %69 : vector<1x8xf32> to vector<144x8xf32>
    %71 = arith.addf %68, %70 : vector<144x8xf32>
    %cst_42 = arith.constant 0.000000e+00 : f32
    %72 = vector.broadcast %cst_42 : f32 to vector<144x8xf32>
    %73 = arith.maximumf %71, %72 : vector<144x8xf32>
    %74 = vector.extract_strided_slice %1 {offsets = [19, 0], sizes = [144, 16], strides = [1, 1]} : vector<198x16xf32> to vector<144x16xf32>
    %75 = arith.truncf %73 : vector<144x8xf32> to vector<144x8xbf16>
    %c0_43 = arith.constant 0 : index
    %c0_44 = arith.constant 0 : index
    %76 = vector.load %arg8[%c0_43, %c0_44] : memref<8x16xbf16, #tpu.memory_space<vmem>>, vector<8x16xbf16>
    %cst_45 = arith.constant dense<0.000000e+00> : vector<144x16xf32>
    %77 = tpu.matmul %75, %76, %cst_45 {dimension_numbers = #tpu.dot_dimension_numbers<[1], [0], [0], [1], [0, 0, 1, 1], [], []>} : vector<144x8xbf16>, vector<8x16xbf16>, vector<144x16xf32> -> vector<144x16xf32>
    %c0_46 = arith.constant 0 : index
    %c0_47 = arith.constant 0 : index
    %78 = vector.load %arg9[%c0_46, %c0_47] : memref<1x16xf32, #tpu.memory_space<vmem>>, vector<1x16xf32>
    %79 = vector.broadcast %78 : vector<1x16xf32> to vector<144x16xf32>
    %80 = arith.addf %77, %79 : vector<144x16xf32>
    %81 = arith.addf %80, %74 : vector<144x16xf32>
    %cst_48 = arith.constant 0.000000e+00 : f32
    %82 = vector.broadcast %cst_48 : f32 to vector<144x16xf32>
    %83 = arith.maximumf %81, %82 : vector<144x16xf32>
    %c0_49 = arith.constant 0 : index
    %c0_50 = arith.constant 0 : index
    %c0_51 = arith.constant 0 : index
    %c0_52 = arith.constant 0 : index
    %84 = vector.load %arg10[%c0_49, %c0_50, %c0_51, %c0_52] : memref<1x1x144x16xf32, #tpu.memory_space<vmem>>, vector<1x1x144x16xf32>
    %85 = vector.shape_cast %84 : vector<1x1x144x16xf32> to vector<144x16xf32>
    %86 = vector.shape_cast %83 : vector<144x16xf32> to vector<1x1x144x16xf32>
    tpu.vector_store %arg10[%c0_49, %c0_50, %c0_51, %c0_52], %86 {strides = array<i32>} : memref<1x1x144x16xf32, #tpu.memory_space<vmem>>, vector<1x1x144x16xf32>,
    return
  }
  func.func @transform_0(%arg0: i32, %arg1: i32) -> (i32, i32, i32, i32) {
    %c0_i32 = arith.constant 0 : i32
    %c0_i32_0 = arith.constant 0 : i32
    %c0_i32_1 = arith.constant 0 : i32
    return %arg0, %arg1, %c0_i32, %c0_i32_0 : i32, i32, i32, i32
  }
  func.func @transform_1(%arg0: i32, %arg1: i32) -> (i32, i32, i32) {
    %c0_i32 = arith.constant 0 : i32
    %c0_i32_0 = arith.constant 0 : i32
    %c0_i32_1 = arith.constant 0 : i32
    return %arg1, %c0_i32, %c0_i32_0 : i32, i32, i32
  }
  func.func @transform_2(%arg0: i32, %arg1: i32) -> (i32, i32) {
    %c0_i32 = arith.constant 0 : i32
    %c0_i32_0 = arith.constant 0 : i32
    %c0_i32_1 = arith.constant 0 : i32
    return %c0_i32, %c0_i32_0 : i32, i32
  }
  func.func @transform_3(%arg0: i32, %arg1: i32) -> (i32, i32) {
    %c0_i32 = arith.constant 0 : i32
    %c0_i32_0 = arith.constant 0 : i32
    %c0_i32_1 = arith.constant 0 : i32
    return %c0_i32, %c0_i32_0 : i32, i32
  }
  func.func @transform_4(%arg0: i32, %arg1: i32) -> (i32, i32, i32) {
    %c0_i32 = arith.constant 0 : i32
    %c0_i32_0 = arith.constant 0 : i32
    %c0_i32_1 = arith.constant 0 : i32
    %c0_i32_2 = arith.constant 0 : i32
    return %c0_i32, %c0_i32_0, %c0_i32_1 : i32, i32, i32
  }
  func.func @transform_5(%arg0: i32, %arg1: i32) -> (i32, i32) {
    %c0_i32 = arith.constant 0 : i32
    %c0_i32_0 = arith.constant 0 : i32
    %c0_i32_1 = arith.constant 0 : i32
    return %c0_i32, %c0_i32_0 : i32, i32
  }
  func.func @transform_6(%arg0: i32, %arg1: i32) -> (i32, i32) {
    %c0_i32 = arith.constant 0 : i32
    %c0_i32_0 = arith.constant 0 : i32
    %c0_i32_1 = arith.constant 0 : i32
    return %c0_i32, %c0_i32_0 : i32, i32
  }
  func.func @transform_7(%arg0: i32, %arg1: i32) -> (i32, i32) {
    %c0_i32 = arith.constant 0 : i32
    %c0_i32_0 = arith.constant 0 : i32
    %c0_i32_1 = arith.constant 0 : i32
    return %c0_i32, %c0_i32_0 : i32, i32
  }
  func.func @transform_8(%arg0: i32, %arg1: i32) -> (i32, i32, i32, i32) {
    %c0_i32 = arith.constant 0 : i32
    %c0_i32_0 = arith.constant 0 : i32
    %c0_i32_1 = arith.constant 0 : i32
    return %arg0, %arg1, %c0_i32, %c0_i32_0 : i32, i32, i32, i32
  }
}

</mosaic_0001>

<bundles_post_ra>
// kernel: tpu_custom_call.1
= control target key start
LH: loop header
LB: loop body
LE: loop exit
PB: predicated region body
PF: predicated region fallthrough
CT: control target
= control target key end

     0   :  { %s2491_s27 = smov 0   ;;  %s2493_s28 = smov 0   ;;  %s3274_s0 = inlined_call_operand.vmem [shape: f32[2,2,198,16], index: 0, kind: input, shape index: {}]   ;;  %s3275_s1 = inlined_call_operand.vmem [shape: f32[2,198,1], index: 1, kind: input, shape index: {}]   ;;  %s3276_s2 = inlined_call_operand.vmem [shape: bf16[16,8], index: 2, kind: input, shape index: {}]   ;;  %s3277_s3 = inlined_call_operand.vmem [shape: f32[1,8], index: 3, kind: input, shape index: {}]   ;;  %s3278_s4 = inlined_call_operand.vmem [shape: bf16[9,8,8], index: 4, kind: input, shape index: {}]   ;;  %s3279_s5 = inlined_call_operand.vmem [shape: f32[1,8], index: 5, kind: input, shape index: {}]   ;;  %s3280_s6 = inlined_call_operand.vmem [shape: bf16[8,16], index: 6, kind: input, shape index: {}]   ;;  %s3281_s7 = inlined_call_operand.vmem [shape: f32[1,16], index: 7, kind: input, shape index: {}]   ;;  %s3282_s8 = inlined_call_operand.vmem [shape: f32[2,2,144,16], index: 8, kind: output, shape index: {}]  }
   0x1   :  { %s2495_s29 = smov 0   ;;  %s2497_s30 = smov 0  }
   0x2   :  { %s2499_s9 = smov 0  }
   0x3 LB: > { %s27_s10 = sadd.s32 1, %s2435_s29  ;;  %s30_s11 = sadd.s32 1, %s2439_s30  ;;  %s2443_s9 = sphi %s2499_s9, %s18_s9   ;;  %s2439_s30 = sphi %s2497_s30, %s3288_s30   ;;  %s2435_s29 = sphi %s2495_s29, %s3287_s29   ;;  %s2431_s28 = sphi %s2493_s28, %s3286_s28   ;;  %s2427_s27 = sphi %s2491_s27, %s3285_s27  }
   0x4   : > { %p28_p0 = scmp.ge.s32.totalorder %s27_s10, 2  ;;  %p2209_p1 = scmp.ge.s32.totalorder %s2443_s9, 1 }
   0x5   : > { %p292_p2 = scmp.lt.s32.totalorder %s2443_s9, 5 }
   0x6   : > { %s3290_s10 = smov (%p28_p0, %s27_s10), 0  ;;  %s3292_s11 = smov (!%p28_p0, %s30_s11), %s2439_s30 }
   0x7   : > { %p293_p3 = pnand %p2209_p1, %p292_p2  ;;  %p32_p4 = scmp.ge.s32.totalorder %s3292_s11, 2 }
   0x9   : > { %s3294_s11 = smov (%p32_p4, %s3292_s11), 0  ;;  %296 = sbr.rel (%p293_p3) target bundleno = 897 (0x381), region = 52 }
   0xe   : > { %p341_p5 = scmp.lt.s32.totalorder %s2427_s27, 1  ;;  %p339_p6 = scmp.lt.s32.totalorder %s2431_s28, 1  ;;  %v2330_v0 = vld [vmem:[%s3276_s2] sm:$0xff]  ;;  %v2445_v1 = vmov 0   ;;  %vm413_vm0 = vcmask 130048   ;;  %vm826_vm1 = vcmask 1043456  }
   0xf   : > { %2381 = vset.pattern.permute.xlu1 %v2445_v1  ;;  %2380 = vset.pattern.permute.xlu0 %v2445_v1  ;;  %v717_v55 = vld [vmem:[%s3278_s4] sm:$0xf]  ;;  %vm798_vm2 = vcmask 64512   ;;  %vm971_vm3 = vcmask 1046528   ;;  %vm1340_vm4 = vcmask 1045504   ;;  %vm1709_vm7 = vcmask 1044480  }
  0x10   : > { %s3296_s27 = smov (!%p341_p5, %s2427_s27), 1  ;;  %460 = vmatpush.bf16.msra.mxu0 %v2330_v0  ;;  %2382 = vset.pattern.permute.xlu2 %v2445_v1  ;;  %s3298_s28 = smov (!%p339_p6, %s2431_s28), 1  ;;  %v903_v56 = vsel %vm826_vm1, %v717_v55, 0  ;;  %vm721_vm5 = vsmask.f32 7424 }
  0x11   : > { %s2336_s14 = smul.u32 200, %s3296_s27  ;;  %2332 = vmatpush.bf16.msra.mxu2 %v903_v56  ;;  %vm1186_vm6 = vsmask.f32 6400  ;;  %vm1555_vm8 = vsmask.f32 5376 }
  0x12   : > { %s2334_s15 = smul.u32 25, %s3296_s27 }
  0x13   : > { %s2533_s18 = scalar_lea.vmem %s3275_s1, %s2336_s14  ;;  %s2335_s19 = smul.u32 50, %s3298_s28 }
  0x14   : > { %v551_v2 = vld [vmem:[%s2533_s18 + $0x20] sm:$0xff]  ;;  %v549_v3 = vld [vmem:[%s2533_s18 + $0x10] sm:$0xff]  ;;  %v552_v8 = vld [vmem:[%s2533_s18 + $0x28] sm:$0xff] }
  0x15   : > { %v553_v4 = vld [vmem:[%s2533_s18 + $0x30] sm:$0xff]  ;;  %592 = vperm.xlu1 %2381, %v551_v2   ;;  %s345_s20 = sadd.s32 %s2335_s19, %s2334_s15  ;;  %582 = vperm.xlu0 %2380, %v549_v3   ;;  %v550_v9 = vld [vmem:[%s2533_s18 + $0x18] sm:$0xff]  ;;  %v556_v11 = vld [vmem:[%s2533_s18 + $0x48] sm:$0xff] }
  0x16   : > { %s2210_s21 = sshll.u32 %s345_s20, 3  ;;  %602 = vperm.xlu2 %2382, %v553_v4   ;;  %v554_v10 = vld [vmem:[%s2533_s18 + $0x38] sm:$0xff]  ;;  %v555_v12 = vld [vmem:[%s2533_s18 + $0x40] sm:$0xff]  ;;  %v557_v13 = vld [vmem:[%s2533_s18 + $0x50] sm:$0xff]  ;;  %s2337_s20 = smul.u32 18, %s3296_s27 }
  0x17   : > { %s2542_s24 = scalar_lea.vmem %s3274_s0, %s2210_s21  ;;  %v559_v17 = vld [vmem:[%s2533_s18 + $0x60] sm:$0xff]  ;;  %v558_v18 = vld [vmem:[%s2533_s18 + $0x58] sm:$0xff]  ;;  %v560_v19 = vld [vmem:[%s2533_s18 + $0x68] sm:$0xff]  ;;  %s2338_s21 = smul.u32 36, %s3298_s28 }
  0x18   : > { %v363_v5 = vld [vmem:[%s2542_s24] sm:$0xff]  ;;  %v364_v6 = vld [vmem:[%s2542_s24 + $0x8] sm:$0xff]  ;;  %v365_v14 = vld [vmem:[%s2542_s24 + $0x10] sm:$0xff] }
  0x19   : > { %v388_v7 = vpack.c.bf16 %v364_v6, %v363_v5  ;;  %v366_v15 = vld [vmem:[%s2542_s24 + $0x18] sm:$0xff]  ;;  %v561_v21 = vld [vmem:[%s2533_s18 + $0x70] sm:$0xff]  ;;  %v563_v22 = vld [vmem:[%s2533_s18 + $0x80] sm:$0xff]  ;;  %s359_s25 = sadd.s32 %s2338_s21, %s2337_s20 }
  0x1a   : > { %v389_v16 = vpack.c.bf16 %v366_v15, %v365_v14  ;;  %v562_v20 = vld [vmem:[%s2533_s18 + $0x78] sm:$0xff]  ;;  %v367_v23 = vld [vmem:[%s2542_s24 + $0x20] sm:$0xff]  ;;  %v368_v24 = vld [vmem:[%s2542_s24 + $0x28] sm:$0xff]  ;;  %s2212_s26 = sshll.u32 %s359_s25, 3 }
  0x1b   : > { %2217 = vmatmul.msk.bf16.vlgmr.msra.gmra.mxu0 %vm413_vm0, %v388_v7  ;;  %v390_v25 = vpack.c.bf16 %v368_v24, %v367_v23  ;;  %v565_v26 = vld [vmem:[%s2533_s18 + $0x90] sm:$0xff]  ;;  %v564_v27 = vld [vmem:[%s2533_s18 + $0x88] sm:$0xff]  ;;  %v547_v28 = vld [vmem:[%s2533_s18] sm:$0xff]  ;;  %s3178_s12 = scalar_lea.vmem %s3282_s8, %s2212_s26 }
  0x1c   : > { %v566_v29 = vld [vmem:[%s2533_s18 + $0x98] sm:$0xff]  ;;  %v548_v30 = vld [vmem:[%s2533_s18 + $0x8] sm:$0xff]  ;;  %v369_v31 = vld [vmem:[%s2542_s24 + $0x30] sm:$0xff] }
  0x1d   : > { %597 = vperm.xlu1 %2381, %v552_v8   ;;  %587 = vperm.xlu0 %2380, %v550_v9   ;;  %v370_v32 = vld [vmem:[%s2542_s24 + $0x38] sm:$0xff]  ;;  %v569_v34 = vld [vmem:[%s2533_s18 + $0xb0] sm:$0xff]  ;;  %v568_v35 = vld [vmem:[%s2533_s18 + $0xa8] sm:$0xff] }
  0x1e   : > { %607 = vperm.xlu2 %2382, %v554_v10   ;;  %v391_v33 = vpack.c.bf16 %v370_v32, %v369_v31  ;;  %v567_v36 = vld [vmem:[%s2533_s18 + $0xa0] sm:$0xff]  ;;  %v372_v38 = vld [vmem:[%s2542_s24 + $0x48] sm:$0xff]  ;;  %v373_v40 = vld [vmem:[%s2542_s24 + $0x50] sm:$0xff] }
  0x1f   : > { %v371_v37 = vld [vmem:[%s2542_s24 + $0x40] sm:$0xff]  ;;  %v374_v41 = vld [vmem:[%s2542_s24 + $0x58] sm:$0xff]  ;;  %v376_v44 = vld [vmem:[%s2542_s24 + $0x68] sm:$0xff] }
  0x20   : > { %v392_v39 = vpack.c.bf16 %v372_v38, %v371_v37  ;;  %v393_v42 = vpack.c.bf16 %v374_v41, %v373_v40  ;;  %v375_v43 = vld [vmem:[%s2542_s24 + $0x60] sm:$0xff]  ;;  %v377_v47 = vld [vmem:[%s2542_s24 + $0x70] sm:$0xff]  ;;  %v378_v48 = vld [vmem:[%s2542_s24 + $0x78] sm:$0xff] }
  0x21   : > { %v394_v45 = vpack.c.bf16 %v376_v44, %v375_v43  ;;  %v395_v50 = vpack.c.bf16 %v378_v48, %v377_v47  ;;  %v379_v53 = vld [vmem:[%s2542_s24 + $0x80] sm:$0xff]  ;;  %v380_v54 = vld [vmem:[%s2542_s24 + $0x88] sm:$0xff]  ;;  %v381_v0 = vld [vmem:[%s2542_s24 + $0x90] sm:$0xff] }
  0x22   : > { %v396_v59 = vpack.c.bf16 %v380_v54, %v379_v53  ;;  %v382_v1 = vld [vmem:[%s2542_s24 + $0x98] sm:$0xff]  ;;  %v2249_v4 = vld [vmem:[%s3278_s4 + $0x8] sm:$0xf]  ;;  %v2230_v7 = vld [vmem:[%s3278_s4 + $0x4] sm:$0xf] }
  0x23   : > { %v397_v3 = vpack.c.bf16 %v382_v1, %v381_v0  ;;  %v2615_v6 = vsel %vm826_vm1, %v2249_v4, 0  ;;  %v828_v8 = vsel %vm826_vm1, %v2230_v7, 0  ;;  %v2627_v10 = vld [vmem:[%s3277_s3] ss:$0 sm:$0xff]  ;;  %v2259_v14 = vld [vmem:[%s3278_s4 + $0xc] sm:$0xf] }
  0x24   : > { %2333 = vmatpush.bf16.msra.mxu3 %v2615_v6  ;;  %2331 = vmatpush.bf16.msra.mxu1 %v828_v8  ;;  %v383_v24 = vld [vmem:[%s2542_s24 + $0xa0] sm:$0xff]  ;;  %v385_v54 = vld [vmem:[%s2542_s24 + $0xb0] sm:$0xff]  ;;  %v386_v55 = vld [vmem:[%s2542_s24 + $0xb8] sm:$0xff] }
  0x25   : > { %617 = vperm.xlu1 %2381, %v556_v11   ;;  %612 = vperm.xlu0 %2380, %v555_v12   ;;  %v2269_v12 = vld [vmem:[%s3278_s4 + $0x10] sm:$0xf] }
  0x26   : > { %622 = vperm.xlu2 %2382, %v557_v13   ;;  %837 = vmatpush.bf16.msrb.mxu0 %v828_v8  ;;  %v1264_v13 = vsel %vm826_vm1, %v2269_v12, 0 }
  0x27   : > { %1273 = vmatpush.bf16.msrb.mxu2 %v1264_v13 }
  0x2a   : > { %912 = vmatpush.bf16.msra.mxu0 %v903_v56 }
  0x2b   : > { %2218 = vmatmul.msk.bf16.gmra.mxu0 %vm413_vm0, %v389_v16  ;;  %v1110_v16 = vsel %vm826_vm1, %v2259_v14, 0 }
  0x2c   : > { %1119 = vmatpush.bf16.msrb.mxu1 %v1110_v16 }
  0x2d   : > { %632 = vperm.xlu1 %2381, %v559_v17   ;;  %627 = vperm.xlu0 %2380, %v558_v18  }
  0x2e   : > { %637 = vperm.xlu2 %2382, %v560_v19  }
  0x35   : > { %647 = vperm.xlu1 %2381, %v562_v20   ;;  %642 = vperm.xlu0 %2380, %v561_v21  }
  0x36   : > { %652 = vperm.xlu2 %2382, %v563_v22  }
  0x3b   : > { %2219 = vmatmul.msk.bf16.gmra.mxu0 %vm413_vm0, %v390_v25  ;;  %v384_v25 = vld [vmem:[%s2542_s24 + $0xa8] sm:$0xff] }
  0x3c   : > { %v398_v32 = vpack.c.bf16 %v384_v25, %v383_v24 }
  0x3d   : > { %662 = vperm.xlu1 %2381, %v565_v26   ;;  %657 = vperm.xlu0 %2380, %v564_v27  }
  0x3e   : > { %572 = vperm.xlu2 %2382, %v547_v28  }
  0x45   : > { %667 = vperm.xlu1 %2381, %v566_v29   ;;  %577 = vperm.xlu0 %2380, %v548_v30  }
  0x46   : > { %672 = vperm.xlu2 %2382, %v567_v36  }
  0x4b   : > { %2220 = vmatmul.msk.bf16.gmra.mxu0 %vm413_vm0, %v391_v33 }
  0x4d   : > { %682 = vperm.xlu1 %2381, %v569_v34   ;;  %677 = vperm.xlu0 %2380, %v568_v35  }
  0x5b   : > { %2221 = vmatmul.msk.bf16.gmra.mxu0 %vm413_vm0, %v392_v39 }
  0x6b   : > { %2222 = vmatmul.msk.bf16.gmra.mxu0 %vm413_vm0, %v393_v42 }
  0x70   : > { %v2585_v46 = vpop.permute.xlu2 %602 }
  0x78   : > { %v2590_v51 = vpop.permute.xlu2 %607 }
  0x7b   : > { %2223 = vmatmul.msk.bf16.gmra.mxu0 %vm413_vm0, %v394_v45 }
  0x80   : > { %v2598_v57 = vpop.permute.xlu2 %622 }
  0x87   : > { %v583_v49 = vpop.permute.xlu0 %582  ;;  %v593_v38 = vpop.permute.xlu1 %592 }
  0x88   : > { %v2605_v63 = vpop.permute.xlu2 %637 }
  0x8b   : > { %2224 = vmatmul.msk.bf16.gmra.mxu0 %vm413_vm0, %v395_v50 }
  0x8f   : > { %v588_v52 = vpop.permute.xlu0 %587  ;;  %v598_v53 = vpop.permute.xlu1 %597 }
  0x90   : > { %v2622_v9 = vpop.permute.xlu2 %652 }
  0x97   : > { %v2600_v58 = vpop.permute.xlu0 %612 }
  0x98   : > { %v462_v60 = vpop.f32.mrf.mxu0  ;;  %v573_v26 = vpop.permute.xlu2 %572 }
  0x99   : > { %v463_v17 = vadd.f32 %v2627_v10, %v462_v60 }
  0x9b   : > { %2225 = vmatmul.msk.bf16.gmra.mxu0 %vm413_vm0, %v396_v59  ;;  %v524_v23 = vmax.f32 %v463_v17, 0.0 }
  0x9d   : > { %v685_v33 = vmul.f32 %v573_v26, %v524_v23 }
  0x9f   : > { %v2603_v61 = vpop.permute.xlu0 %627 }
  0xa0   : > { %v464_v62 = vpop.f32.mrf.mxu0 }
  0xa1   : > { %v465_v21 = vadd.f32 %v2627_v10, %v464_v62  ;;  %v399_v62 = vpack.c.bf16 %v386_v55, %v385_v54 }
  0xa3   : > { %v525_v29 = vmax.f32 %v465_v21, 0.0 }
  0xa7   : > { %v2609_v2 = vpop.permute.xlu0 %642 }
  0xa8   : > { %v467_v5 = vpop.f32.mrf.mxu0 }
  0xa9   : > { %v468_v11 = vadd.f32 %v2627_v10, %v467_v5 }
  0xab   : > { %2226 = vmatmul.msk.bf16.gmra.mxu0 %vm413_vm0, %v397_v3  ;;  %v526_v19 = vmax.f32 %v468_v11, 0.0 }
  0xad   : > { %v687_v27 = vmul.f32 %v583_v49, %v526_v19 }
  0xaf   : > { %v2638_v15 = vpop.permute.xlu0 %657 }
  0xb0   : > { %v469_v18 = vpop.f32.mrf.mxu0 }
  0xb1   : > { %v470_v20 = vadd.f32 %v2627_v10, %v469_v18 }
  0xb3   : > { %v527_v22 = vmax.f32 %v470_v20, 0.0 }
  0xb5   : > { %v688_v28 = vmul.f32 %v588_v52, %v527_v22 }
  0xb7   : > { %v709_v30 = vpack.c.bf16 %v688_v28, %v687_v27  ;;  %v578_v31 = vpop.permute.xlu0 %577 }
  0xb8   : > { %v472_v34 = vpop.f32.mrf.mxu0  ;;  %v686_v35 = vmul.f32 %v578_v31, %v525_v29  ;;  %v387_v29 = vld [vmem:[%s2542_s24 + $0xc0] sm:$0x3f] }
  0xb9   : > { %2241 = vmatmul.msk.bf16.vlgmr.msra.gmra.mxu2 %vm798_vm2, %v709_v30  ;;  %v730_v36 = vshll.u32 %v709_v30, 16  ;;  %v734_v37 = vshrl.u32 %v709_v30, 16  ;;  %v973_v43 = vrot.slane %v709_v30, 1  ;;  %v473_v44 = vadd.f32 %v2627_v10, %v472_v34 }
  0xba   : > { %v2647_v39 = vpack.c.bf16 %v686_v35, %v685_v33  ;;  %v1341_v8 = vrot.slane %v709_v30, 2  ;;  %v400_v33 = vpack.c.bf16 %v387_v29, %v387_v29 }
  0xbb   : > { %2227 = vmatmul.msk.bf16.gmra.mxu0 %vm413_vm0, %v398_v32  ;;  %v1187_v40 = vrot.slane %v734_v37, 1  ;;  %v1188_v41 = vrot.slane %v730_v36, 2  ;;  %v528_v49 = vmax.f32 %v473_v44, 0.0  ;;  %v2658_v0 = vrot.slane %v730_v36, 1 }
  0xbc   : > { %v972_v42 = vrot.slane %v2647_v39, 1  ;;  %v725_v54 = vshll.u32 %v2647_v39, 16 }
  0xbd   : > { %v1189_v45 = vor.u32 %v1188_v41, %v1187_v40  ;;  %v689_v56 = vmul.f32 %v593_v38, %v528_v49  ;;  %v736_v12 = vor.u32 %v734_v37, %v2658_v0 }
  0xbe   : > { %v2653_v47 = vsel %vm971_vm3, %v972_v42, %v973_v43 }
  0xc0   : > { %v474_v48 = vpop.f32.mrf.mxu0 }
  0xc1   : > { %v475_v50 = vadd.f32 %v2627_v10, %v474_v48 }
  0xc3   : > { %v529_v52 = vmax.f32 %v475_v50, 0.0 }
  0xc5   : > { %v690_v59 = vmul.f32 %v598_v53, %v529_v52 }
  0xc7   : > { %v710_v60 = vpack.c.bf16 %v690_v59, %v689_v56 }
  0xc8   : > { %v477_v1 = vpop.f32.mrf.mxu0 }
  0xc9   : > { %2242 = vmatmul.msk.bf16.gmra.mxu2 %vm798_vm2, %v710_v60  ;;  %v975_v3 = vrot.slane %v710_v60, 1  ;;  %v738_v4 = vshll.u32 %v710_v60, 16  ;;  %v742_v5 = vshrl.u32 %v710_v60, 16  ;;  %v1342_v7 = vrot.slane %v710_v60, 2 }
  0xca   : > { %v478_v20 = vadd.f32 %v2627_v10, %v477_v1  ;;  %v1710_v40 = vrot.slane %v710_v60, 3 }
  0xcb   : > { %2228 = vmatmul.msk.bf16.gmra.mxu0 %vm413_vm0, %v399_v62  ;;  %v2663_v11 = vsel %vm971_vm3, %v973_v43, %v975_v3  ;;  %v740_v13 = vrot.slane %v738_v4, 1  ;;  %v1190_v14 = vrot.slane %v742_v5, 1  ;;  %v1191_v16 = vrot.slane %v738_v4, 2 }
  0xcc   : > { %2251 = vmatmul.msk.bf16.vlgmr.msra.gmra.mxu3 %vm798_vm2, %v2663_v11  ;;  %v2669_v17 = vsel %vm1340_vm4, %v1341_v8, %v1342_v7  ;;  %v1556_v18 = vrot.slane %v742_v5, 2  ;;  %v1557_v19 = vrot.slane %v738_v4, 3  ;;  %v530_v26 = vmax.f32 %v478_v20, 0.0 }
  0xcd   : > { %v741_v21 = vsel %vm721_vm5, %v736_v12, %v740_v13  ;;  %v1192_v22 = vor.u32 %v1191_v16, %v1190_v14  ;;  %v727_v4 = vrot.slane %v725_v54, 1  ;;  %v723_v8 = vshrl.u32 %v2647_v39, 16 }
  0xce   : > { %2232 = vmatmul.msk.bf16.vlgmr.msra.gmra.mxu1 %vm798_vm2, %v741_v21  ;;  %v1558_v23 = vor.u32 %v1557_v19, %v1556_v18  ;;  %v691_v30 = vmul.f32 %v2585_v46, %v530_v26  ;;  %v744_v46 = vor.u32 %v742_v5, %v740_v13 }
  0xcf   : > { %v2675_v25 = vsel %vm1186_vm6, %v1189_v45, %v1192_v22  ;;  %v728_v14 = vor.u32 %v727_v4, %v723_v8 }
  0xd0   : > { %v479_v24 = vpop.f32.mrf.mxu0 }
  0xd1   : > { %v480_v27 = vadd.f32 %v2627_v10, %v479_v24 }
  0xd3   : > { %v531_v28 = vmax.f32 %v480_v27, 0.0 }
  0xd5   : > { %v692_v31 = vmul.f32 %v2590_v51, %v531_v28 }
  0xd7   : > { %v711_v32 = vpack.c.bf16 %v692_v31, %v691_v30 }
  0xd8   : > { %v482_v34 = vpop.f32.mrf.mxu0 }
  0xd9   : > { %2243 = vmatmul.msk.bf16.gmra.mxu2 %vm798_vm2, %v711_v32  ;;  %v977_v35 = vrot.slane %v711_v32, 1  ;;  %v746_v36 = vshll.u32 %v711_v32, 16  ;;  %v750_v37 = vshrl.u32 %v711_v32, 16  ;;  %v1344_v38 = vrot.slane %v711_v32, 2 }
  0xda   : > { %v1711_v41 = vrot.slane %v711_v32, 3  ;;  %v483_v50 = vadd.f32 %v2627_v10, %v482_v34 }
  0xdb   : > { %2229 = vmatmul.msk.bf16.gmra.mxu0 %vm413_vm0, %v400_v33  ;;  %v2684_v42 = vsel %vm971_vm3, %v975_v3, %v977_v35  ;;  %v748_v43 = vrot.slane %v746_v36, 1  ;;  %v1194_v51 = vrot.slane %v750_v37, 1  ;;  %v2689_v44 = vsel %vm1340_vm4, %v1342_v7, %v1344_v38  ;;  %v618_v7 = vpop.permute.xlu1 %617 }
  0xdc   : > { %2252 = vmatmul.msk.bf16.gmra.mxu3 %vm798_vm2, %v2684_v42  ;;  %v1195_v45 = vrot.slane %v746_v36, 2  ;;  %v2692_v48 = vsel %vm1709_vm7, %v1710_v40, %v1711_v41  ;;  %v1559_v49 = vrot.slane %v750_v37, 2  ;;  %v1560_v53 = vrot.slane %v746_v36, 3 }
  0xdd   : > { %v749_v52 = vsel %vm721_vm5, %v744_v46, %v748_v43  ;;  %v532_v62 = vmax.f32 %v483_v50, 0.0 }
  0xde   : > { %2233 = vmatmul.msk.bf16.gmra.mxu1 %vm798_vm2, %v749_v52  ;;  %v1196_v55 = vor.u32 %v1195_v45, %v1194_v51  ;;  %v1561_v56 = vor.u32 %v1560_v53, %v1559_v49  ;;  %v2289_v45 = vld [vmem:[%s3278_s4 + $0x18] sm:$0xf] }
  0xdf   : > { %v693_v12 = vmul.f32 %v2600_v58, %v532_v62  ;;  %v752_v58 = vor.u32 %v750_v37, %v748_v43 }
  0xe0   : > { %v484_v59 = vpop.f32.mrf.mxu0  ;;  %v2699_v60 = vsel %vm1186_vm6, %v1192_v22, %v1196_v55  ;;  %v2703_v3 = vsel %vm1555_vm8, %v1558_v23, %v1561_v56  ;;  %v733_v22 = vsel %vm721_vm5, %v728_v14, %v2658_v0 }
  0xe1   : > { %v485_v1 = vadd.f32 %v2627_v10, %v484_v59 }
  0xe3   : > { %v533_v5 = vmax.f32 %v485_v1, 0.0 }
  0xe5   : > { %v694_v13 = vmul.f32 %v618_v7, %v533_v5 }
  0xe7   : > { %v712_v16 = vpack.c.bf16 %v694_v13, %v693_v12 }
  0xe8   : > { %v487_v18 = vpop.f32.mrf.mxu0 }
  0xe9   : > { %2244 = vmatmul.msk.bf16.gmra.mxu2 %vm798_vm2, %v712_v16  ;;  %v979_v19 = vrot.slane %v712_v16, 1  ;;  %v754_v20 = vshll.u32 %v712_v16, 16  ;;  %v758_v21 = vshrl.u32 %v712_v16, 16  ;;  %v1346_v23 = vrot.slane %v712_v16, 2 }
  0xea   : > { %v1713_v24 = vrot.slane %v712_v16, 3  ;;  %v488_v32 = vadd.f32 %v2627_v10, %v487_v18 }
  0xeb   : > { %2231 = vmatmul.msk.bf16.vlgmr.msrb.gmra.mxu0 %vm798_vm2, %v733_v22  ;;  %v2712_v26 = vsel %vm971_vm3, %v977_v35, %v979_v19  ;;  %v756_v27 = vrot.slane %v754_v20, 1  ;;  %v1198_v28 = vrot.slane %v758_v21, 1  ;;  %v2718_v29 = vsel %vm1340_vm4, %v1344_v38, %v1346_v23 }
  0xec   : > { %2253 = vmatmul.msk.bf16.gmra.mxu3 %vm798_vm2, %v2712_v26  ;;  %1028 = vmatpush.bf16.msrb.mxu0 %v2615_v6  ;;  %v1199_v30 = vrot.slane %v754_v20, 2  ;;  %v2721_v0 = vsel %vm1709_vm7, %v1711_v41, %v1713_v24  ;;  %v1563_v31 = vrot.slane %v758_v21, 2  ;;  %v1564_v34 = vrot.slane %v754_v20, 3 }
  0xed   : > { %v757_v33 = vsel %vm721_vm5, %v752_v58, %v756_v27  ;;  %v534_v38 = vmax.f32 %v488_v32, 0.0 }
  0xee   : > { %2234 = vmatmul.msk.bf16.gmra.mxu1 %vm798_vm2, %v757_v33  ;;  %v1200_v35 = vor.u32 %v1199_v30, %v1198_v28  ;;  %v1565_v36 = vor.u32 %v1564_v34, %v1563_v31 }
  0xef   : > { %v695_v43 = vmul.f32 %v2598_v57, %v534_v38 }
  0xf0   : > { %v489_v37 = vpop.f32.mrf.mxu0  ;;  %v2727_v6 = vsel %vm1186_vm6, %v1196_v55, %v1200_v35  ;;  %v2731_v41 = vsel %vm1555_vm8, %v1561_v56, %v1565_v36  ;;  %v1479_v55 = vsel %vm826_vm1, %v2289_v45, 0 }
  0xf1   : > { %v490_v40 = vadd.f32 %v2627_v10, %v489_v37 }
  0xf3   : > { %v535_v46 = vmax.f32 %v490_v40, 0.0 }
  0xf5   : > { %v696_v51 = vmul.f32 %v2603_v61, %v535_v46  ;;  %v760_v61 = vor.u32 %v758_v21, %v756_v27 }
  0xf7   : > { %v713_v49 = vpack.c.bf16 %v696_v51, %v695_v43 }
  0xf8   : > { %v492_v50 = vpop.f32.mrf.mxu0 }
  0xf9   : > { %2245 = vmatmul.msk.bf16.gmra.mxu2 %vm798_vm2, %v713_v49  ;;  %v981_v52 = vrot.slane %v713_v49, 1  ;;  %v762_v53 = vshll.u32 %v713_v49, 16  ;;  %v766_v54 = vshrl.u32 %v713_v49, 16  ;;  %v1348_v56 = vrot.slane %v713_v49, 2 }
  0xfa   : > { %v1715_v59 = vrot.slane %v713_v49, 3 }
  0xfb   : > { %2240 = vmatmul.msk.bf16.vlgmr.msra.gmra.mxu0 %vm798_vm2, %v2647_v39  ;;  %v2743_v57 = vsel %vm971_vm3, %v979_v19, %v981_v52  ;;  %v764_v62 = vrot.slane %v762_v53, 1  ;;  %v1202_v1 = vrot.slane %v766_v54, 1  ;;  %v2748_v4 = vsel %vm1340_vm4, %v1346_v23, %v1348_v56 }
  0xfc   : > { %2254 = vmatmul.msk.bf16.gmra.mxu3 %vm798_vm2, %v2743_v57  ;;  %1488 = vmatpush.bf16.msra.mxu0 %v1479_v55  ;;  %v1203_v5 = vrot.slane %v762_v53, 2  ;;  %v2751_v7 = vsel %vm1709_vm7, %v1713_v24, %v1715_v59  ;;  %v1567_v8 = vrot.slane %v766_v54, 2  ;;  %v493_v39 = vadd.f32 %v2627_v10, %v492_v50  ;;  %v633_v24 = vpop.permute.xlu1 %632 }
  0xfd   : > { %v765_v12 = vsel %vm721_vm5, %v760_v61, %v764_v62  ;;  %v1568_v13 = vrot.slane %v762_v53, 3  ;;  %v768_v37 = vor.u32 %v766_v54, %v764_v62 }
  0xfe   : > { %2235 = vmatmul.msk.bf16.gmra.mxu1 %vm798_vm2, %v765_v12  ;;  %v1204_v14 = vor.u32 %v1203_v5, %v1202_v1  ;;  %v536_v20 = vmax.f32 %v493_v39, 0.0 }
  0xff   : > { %v1569_v16 = vor.u32 %v1568_v13, %v1567_v8 }
 0x100   : > { %v494_v18 = vpop.f32.mrf.mxu0  ;;  %v2757_v19 = vsel %vm1186_vm6, %v1200_v35, %v1204_v14  ;;  %v697_v58 = vmul.f32 %v633_v24, %v536_v20 }
 0x101   : > { %v495_v21 = vadd.f32 %v2627_v10, %v494_v18  ;;  %v2761_v22 = vsel %vm1555_vm8, %v1565_v36, %v1569_v16 }
 0x103   : > { %v537_v23 = vmax.f32 %v495_v21, 0.0 }
 0x104   : > { %v648_v62 = vpop.permute.xlu1 %647 }
 0x105   : > { %v698_v27 = vmul.f32 %v2605_v63, %v537_v23 }
 0x107   : > { %v714_v28 = vpack.c.bf16 %v698_v27, %v697_v58 }
 0x108   : > { %v497_v30 = vpop.f32.mrf.mxu0 }
 0x109   : > { %2246 = vmatmul.msk.bf16.gmra.mxu2 %vm798_vm2, %v714_v28  ;;  %v983_v31 = vrot.slane %v714_v28, 1  ;;  %v770_v32 = vshll.u32 %v714_v28, 16  ;;  %v774_v33 = vshrl.u32 %v714_v28, 16  ;;  %v1350_v34 = vrot.slane %v714_v28, 2 }
 0x10a   : > { %v1717_v35 = vrot.slane %v714_v28, 3  ;;  %v498_v45 = vadd.f32 %v2627_v10, %v497_v30 }
 0x10b   : > { %2250 = vmatmul.msk.bf16.vlgmr.msrb.gmra.mxu0 %vm798_vm2, %v2653_v47  ;;  %v2768_v36 = vsel %vm971_vm3, %v981_v52, %v983_v31  ;;  %v772_v38 = vrot.slane %v770_v32, 1  ;;  %v1206_v40 = vrot.slane %v774_v33, 1  ;;  %v2773_v63 = vsel %vm1340_vm4, %v1348_v56, %v1350_v34 }
 0x10c   : > { %2255 = vmatmul.msk.bf16.gmra.mxu3 %vm798_vm2, %v2768_v36  ;;  %v1207_v46 = vrot.slane %v770_v32, 2  ;;  %v2776_v43 = vsel %vm1709_vm7, %v1715_v59, %v1717_v35  ;;  %v1571_v51 = vrot.slane %v774_v33, 2  ;;  %v1572_v49 = vrot.slane %v770_v32, 3 }
 0x10d   : > { %v773_v47 = vsel %vm721_vm5, %v768_v37, %v772_v38  ;;  %v538_v55 = vmax.f32 %v498_v45, 0.0  ;;  %v776_v21 = vor.u32 %v774_v33, %v772_v38 }
 0x10e   : > { %2236 = vmatmul.msk.bf16.gmra.mxu1 %vm798_vm2, %v773_v47  ;;  %v1208_v50 = vor.u32 %v1207_v46, %v1206_v40  ;;  %v1573_v52 = vor.u32 %v1572_v49, %v1571_v51 }
 0x10f   : > { %v699_v1 = vmul.f32 %v2609_v2, %v538_v55  ;;  %v2279_v55 = vld [vmem:[%s3278_s4 + $0x14] sm:$0xf] }
 0x110   : > { %v499_v53 = vpop.f32.mrf.mxu0  ;;  %v2782_v54 = vsel %vm1186_vm6, %v1204_v14, %v1208_v50  ;;  %v2786_v59 = vsel %vm1555_vm8, %v1569_v16, %v1573_v52 }
 0x111   : > { %v500_v56 = vadd.f32 %v2627_v10, %v499_v53 }
 0x113   : > { %v539_v61 = vmax.f32 %v500_v56, 0.0 }
 0x115   : > { %v700_v5 = vmul.f32 %v648_v62, %v539_v61  ;;  %v663_v61 = vpop.permute.xlu1 %662  ;;  %v1388_v62 = vsel %vm826_vm1, %v2279_v55, 0 }
 0x116   : > { %1397 = vmatpush.bf16.msrb.mxu3 %v1388_v62 }
 0x117   : > { %v715_v8 = vpack.c.bf16 %v700_v5, %v699_v1 }
 0x118   : > { %v502_v39 = vpop.f32.mrf.mxu0 }
 0x119   : > { %2247 = vmatmul.msk.bf16.gmra.mxu2 %vm798_vm2, %v715_v8  ;;  %v985_v12 = vrot.slane %v715_v8, 1  ;;  %v778_v13 = vshll.u32 %v715_v8, 16  ;;  %v782_v18 = vshrl.u32 %v715_v8, 16  ;;  %v1352_v14 = vrot.slane %v715_v8, 2 }
 0x11a   : > { %v1719_v20 = vrot.slane %v715_v8, 3  ;;  %v503_v30 = vadd.f32 %v2627_v10, %v502_v39 }
 0x11b   : > { %2290 = vmatmul.msk.bf16.vlgmr.msra.gmra.mxu0 %vm798_vm2, %v2689_v44  ;;  %v2793_v16 = vsel %vm971_vm3, %v983_v31, %v985_v12  ;;  %v780_v23 = vrot.slane %v778_v13, 1  ;;  %v1210_v24 = vrot.slane %v782_v18, 1  ;;  %v2798_v2 = vsel %vm1340_vm4, %v1350_v34, %v1352_v14 }
 0x11c   : > { %2256 = vmatmul.msk.bf16.gmra.mxu3 %vm798_vm2, %v2793_v16  ;;  %v1211_v58 = vrot.slane %v778_v13, 2  ;;  %v2801_v27 = vsel %vm1709_vm7, %v1717_v35, %v1719_v20  ;;  %v1575_v28 = vrot.slane %v782_v18, 2  ;;  %v1576_v31 = vrot.slane %v778_v13, 3 }
 0x11d   : > { %v781_v32 = vsel %vm721_vm5, %v776_v21, %v780_v23  ;;  %v540_v34 = vmax.f32 %v503_v30, 0.0  ;;  %v668_v55 = vpop.permute.xlu1 %667 }
 0x11e   : > { %2237 = vmatmul.msk.bf16.gmra.mxu1 %vm798_vm2, %v781_v32  ;;  %v1212_v33 = vor.u32 %v1211_v58, %v1210_v24  ;;  %v1577_v37 = vor.u32 %v1576_v31, %v1575_v28  ;;  %v2309_v31 = vld [vmem:[%s3278_s4 + $0x20] sm:$0xf] }
 0x11f   : > { %v701_v45 = vmul.f32 %v2622_v9, %v540_v34 }
 0x120   : > { %v504_v38 = vpop.f32.mrf.mxu0  ;;  %v2807_v40 = vsel %vm1186_vm6, %v1208_v50, %v1212_v33  ;;  %v2811_v35 = vsel %vm1555_vm8, %v1573_v52, %v1577_v37 }
 0x121   : > { %v505_v46 = vadd.f32 %v2627_v10, %v504_v38 }
 0x123   : > { %v541_v51 = vmax.f32 %v505_v46, 0.0  ;;  %v1757_v46 = vsel %vm826_vm1, %v2309_v31, 0 }
 0x124   : > { %1766 = vmatpush.bf16.msra.mxu2 %v1757_v46  ;;  %v673_v46 = vpop.permute.xlu2 %672 }
 0x125   : > { %v702_v47 = vmul.f32 %v2638_v15, %v541_v51  ;;  %v784_v15 = vor.u32 %v782_v18, %v780_v23 }
 0x127   : > { %v2815_v49 = vpack.c.bf16 %v702_v47, %v701_v45 }
 0x128   : > { %v507_v53 = vpop.f32.mrf.mxu0 }
 0x129   : > { %v508_v50 = vadd.f32 %v2627_v10, %v507_v53  ;;  %2248 = vmatmul.msk.bf16.gmra.mxu2 %vm798_vm2, %v2815_v49  ;;  %v987_v52 = vrot.slane %v2815_v49, 1  ;;  %v786_v56 = vshll.u32 %v2815_v49, 16  ;;  %v790_v9 = vshrl.u32 %v2815_v49, 16 }
 0x12a   : > { %v1354_v1 = vrot.slane %v2815_v49, 2  ;;  %v1721_v5 = vrot.slane %v2815_v49, 3 }
 0x12b   : > { %v542_v8 = vmax.f32 %v508_v50, 0.0  ;;  %2291 = vmatmul.msk.bf16.gmra.mxu0 %vm798_vm2, %v2718_v29  ;;  %v2832_v39 = vsel %vm971_vm3, %v985_v12, %v987_v52  ;;  %v788_v13 = vrot.slane %v786_v56, 1  ;;  %v1214_v21 = vrot.slane %v790_v9, 1 }
 0x12c   : > { %2257 = vmatmul.msk.bf16.gmra.mxu3 %vm798_vm2, %v2832_v39  ;;  %v2837_v18 = vsel %vm1340_vm4, %v1352_v14, %v1354_v1  ;;  %v1215_v23 = vrot.slane %v786_v56, 2  ;;  %v2840_v24 = vsel %vm1709_vm7, %v1719_v20, %v1721_v5  ;;  %v1579_v58 = vrot.slane %v790_v9, 2  ;;  %v2299_v14 = vld [vmem:[%s3278_s4 + $0x1c] sm:$0xf] }
 0x12d   : > { %v703_v28 = vmul.f32 %v663_v61, %v542_v8  ;;  %v789_v30 = vsel %vm721_vm5, %v784_v15, %v788_v13  ;;  %v1580_v32 = vrot.slane %v786_v56, 3  ;;  %v1633_v51 = vsel %vm826_vm1, %v2299_v14, 0 }
 0x12e   : > { %2238 = vmatmul.msk.bf16.gmra.mxu1 %vm798_vm2, %v789_v30  ;;  %v1216_v12 = vor.u32 %v1215_v23, %v1214_v21 }
 0x12f   : > { %v1581_v38 = vor.u32 %v1580_v32, %v1579_v58  ;;  %v718_v34 = vpack.c.bf16 %v703_v28, %v703_v28  ;;  %1642 = vmatpush.bf16.msra.mxu1 %v1633_v51 }
 0x130   : > { %v509_v20 = vpop.f32.mrf.mxu0  ;;  %v2853_v45 = vsel %vm1186_vm6, %v1212_v33, %v1216_v12 }
 0x131   : > { %v510_v47 = vadd.f32 %v2627_v10, %v509_v20  ;;  %v2857_v49 = vsel %vm1555_vm8, %v1577_v37, %v1581_v38  ;;  %v794_v50 = vshll.u32 %v718_v34, 16  ;;  %v989_v61 = vrot.slane %v718_v34, 1 }
 0x132   : > { %v792_v37 = vor.u32 %v790_v9, %v788_v13 }
 0x133   : > { %v543_v53 = vmax.f32 %v510_v47, 0.0  ;;  %v796_v8 = vrot.slane %v794_v50, 1  ;;  %v990_v30 = vsel %vm971_vm3, %v987_v52, %v989_v61 }
 0x135   : > { %v704_v56 = vmul.f32 %v668_v55, %v543_v53  ;;  %v797_v55 = vsel %vm721_vm5, %v792_v37, %v796_v8 }
 0x137   : > { %v1093_v15 = vpack.c.bf16 %v704_v56, %v703_v28 }
 0x138   : > { %v512_v62 = vpop.f32.mrf.mxu0 }
 0x139   : > { %v513_v21 = vadd.f32 %v2627_v10, %v512_v62  ;;  %2270 = vmatmul.msk.bf16.vlgmr.msrb.gmra.mxu2 %vm798_vm2, %v2675_v25  ;;  %v1356_v33 = vrot.slane %v1093_v15, 2  ;;  %v1219_v23 = vshrl.u32 %v1093_v15, 16  ;;  %v1222_v58 = vshll.u32 %v1093_v15, 16 }
 0x13a   : > { %v1099_v32 = vrot.slane %v1093_v15, 1  ;;  %v1723_v31 = vrot.slane %v1093_v15, 3 }
 0x13b   : > { %v544_v14 = vmax.f32 %v513_v21, 0.0  ;;  %2292 = vmatmul.msk.bf16.gmra.mxu0 %vm798_vm2, %v2748_v4  ;;  %v2866_v28 = vsel %vm1340_vm4, %v1354_v1, %v1356_v33  ;;  %v1221_v34 = vrot.slane %v1219_v23, 1  ;;  %v1224_v20 = vrot.slane %v1222_v58, 2 }
 0x13c   : > { %v919_v51 = vpop.f32.mrf.mxu2  ;;  %2258 = vmatmul.msk.bf16.gmra.mxu3 %vm798_vm2, %v990_v30  ;;  %v2870_v25 = vsel %vm971_vm3, %v987_v52, %v1099_v32  ;;  %v2873_v9 = vsel %vm1709_vm7, %v1721_v5, %v1723_v31  ;;  %v1583_v13 = vrot.slane %v1219_v23, 2  ;;  %v1584_v47 = vrot.slane %v1222_v58, 3 }
 0x13d   : > { %v705_v53 = vmul.f32 %v673_v46, %v544_v14  ;;  %v1225_v50 = vor.u32 %v1224_v20, %v1221_v34  ;;  %v678_v34 = vpop.permute.xlu0 %677 }
 0x13e   : > { %2239 = vmatmul.msk.bf16.gmra.mxu1 %vm798_vm2, %v797_v55  ;;  %v1585_v1 = vor.u32 %v1584_v47, %v1583_v13 }
 0x13f   : > { %v1094_v56 = vpack.c.bf16 %v705_v53, %v705_v53  ;;  %v2878_v61 = vsel %vm1186_vm6, %v1216_v12, %v1225_v50 }
 0x140   : > { %v514_v15 = vpop.f32.mrf.mxu0  ;;  %v2881_v52 = vsel %vm1555_vm8, %v1581_v38, %v1585_v1 }
 0x141   : > { %3283 = vst [vmem:[#allocation2_spill] sm:$0xff] %v2881_v52  ;;  %v515_v5 = vadd.f32 %v2627_v10, %v514_v15  ;;  %v1228_v62 = vshrl.u32 %v1094_v56, 16  ;;  %v1231_v21 = vshll.u32 %v1094_v56, 16  ;;  %v1358_v23 = vrot.slane %v1094_v56, 2 }
 0x142   : > { %v1101_v58 = vrot.slane %v1094_v56, 1 }
 0x143   : > { %v545_v30 = vmax.f32 %v515_v5, 0.0  ;;  %v1230_v8 = vrot.slane %v1228_v62, 1  ;;  %v1233_v37 = vrot.slane %v1231_v21, 2  ;;  %v2885_v14 = vsel %vm1340_vm4, %v1356_v33, %v1358_v23 }
 0x144   : > { %v921_v20 = vpop.f32.mrf.mxu2  ;;  %v2888_v12 = vsel %vm971_vm3, %v1099_v32, %v1101_v58 }
 0x145   : > { %v706_v46 = vmul.f32 %v678_v34, %v545_v30  ;;  %v1234_v38 = vor.u32 %v1233_v37, %v1230_v8 }
 0x147   : > { %v1462_v13 = vpack.c.bf16 %v706_v46, %v705_v53  ;;  %v2891_v47 = vsel %vm1186_vm6, %v1225_v50, %v1234_v38 }
 0x148   : > { %v517_v55 = vpop.f32.mrf.mxu0 }
 0x149   : > { %v518_v56 = vadd.f32 %v2627_v10, %v517_v55  ;;  %2271 = vmatmul.msk.bf16.gmra.mxu2 %vm798_vm2, %v2699_v60  ;;  %v1468_v15 = vrot.slane %v1462_v13, 2  ;;  %v1725_v5 = vrot.slane %v1462_v13, 3  ;;  %v1588_v62 = vshrl.u32 %v1462_v13, 16  ;;  %v683_v10 = vpop.permute.xlu1 %682 }
 0x14a   : > { %v1591_v21 = vshll.u32 %v1462_v13, 16 }
 0x14b   : > { %v546_v23 = vmax.f32 %v518_v56, 0.0  ;;  %v844_v52 = vpop.f32.mrf.mxu1  ;;  %2293 = vmatmul.msk.bf16.gmra.mxu0 %vm798_vm2, %v2773_v63  ;;  %v2899_v32 = vsel %vm1340_vm4, %v1356_v33, %v1468_v15  ;;  %v2902_v53 = vsel %vm1709_vm7, %v1723_v31, %v1725_v5  ;;  %v1590_v50 = vrot.slane %v1588_v62, 2 }
 0x14c   : > { %v920_v58 = vadd.f32 %v919_v51, %v844_v52  ;;  %v924_v30 = vpop.f32.mrf.mxu2  ;;  %2280 = vmatmul.msk.bf16.vlgmr.msrb.gmra.mxu3 %vm798_vm2, %v2669_v17  ;;  %v1593_v60 = vrot.slane %v1591_v21, 3 }
 0x14d   : > { %v707_v8 = vmul.f32 %v683_v10, %v546_v23 }
 0x14e   : > { %2260 = vmatmul.msk.bf16.vlgmr.msrb.gmra.mxu1 %vm798_vm2, %v2663_v11  ;;  %v1594_v37 = vor.u32 %v1593_v60, %v1590_v50 }
 0x14f   : > { %v1463_v34 = vpack.c.bf16 %v707_v8, %v707_v8  ;;  %v1035_v46 = vpop.f32.mrf.mxu3 }
 0x150   : > { %v2908_v33 = vadd.f32 %v1035_v46, %v920_v58  ;;  %v519_v38 = vpop.f32.mrf.mxu0  ;;  %v2911_v31 = vsel %vm1555_vm8, %v1585_v1, %v1594_v37 }
 0x151   : > { %v1470_v13 = vrot.slane %v1463_v34, 2  ;;  %v1727_v51 = vrot.slane %v1463_v34, 3  ;;  %v1597_v52 = vshrl.u32 %v1463_v34, 16  ;;  %v1600_v55 = vshll.u32 %v1463_v34, 16 }
 0x153   : > { %v846_v56 = vpop.f32.mrf.mxu1  ;;  %v2914_v17 = vsel %vm1340_vm4, %v1468_v15, %v1470_v13  ;;  %v2917_v62 = vsel %vm1709_vm7, %v1725_v5, %v1727_v51  ;;  %v1599_v11 = vrot.slane %v1597_v52, 2  ;;  %v1602_v21 = vrot.slane %v1600_v55, 3 }
 0x154   : > { %v922_v23 = vadd.f32 %v921_v20, %v846_v56  ;;  %v926_v50 = vpop.f32.mrf.mxu2 }
 0x155   : > { %v1603_v10 = vor.u32 %v1602_v21, %v1599_v11 }
 0x157   : > { %v1037_v58 = vpop.f32.mrf.mxu3  ;;  %v2920_v1 = vsel %vm1555_vm8, %v1594_v37, %v1603_v10 }
 0x158   : > { %v2922_v60 = vadd.f32 %v1037_v58, %v922_v23  ;;  %v521_v8 = vpop.f32.mrf.mxu0 }
 0x159   : > { %2272 = vmatmul.msk.bf16.gmra.mxu2 %vm798_vm2, %v2727_v6 }
 0x15b   : > { %v849_v15 = vpop.f32.mrf.mxu1  ;;  %2294 = vmatmul.msk.bf16.gmra.mxu0 %vm798_vm2, %v2798_v2 }
 0x15c   : > { %v925_v5 = vadd.f32 %v924_v30, %v849_v15  ;;  %v929_v34 = vpop.f32.mrf.mxu2  ;;  %2281 = vmatmul.msk.bf16.gmra.mxu3 %vm798_vm2, %v2689_v44 }
 0x15e   : > { %2261 = vmatmul.msk.bf16.gmra.mxu1 %vm798_vm2, %v2684_v42 }
 0x15f   : > { %v1040_v20 = vpop.f32.mrf.mxu3 }
 0x160   : > { %v2932_v37 = vadd.f32 %v1040_v20, %v925_v5  ;;  %v522_v46 = vpop.f32.mrf.mxu0 }
 0x163   : > { %v851_v38 = vpop.f32.mrf.mxu1 }
 0x164   : > { %v927_v13 = vadd.f32 %v926_v50, %v851_v38  ;;  %v931_v51 = vpop.f32.mrf.mxu2 }
 0x167   : > { %v1042_v6 = vpop.f32.mrf.mxu3 }
 0x168   : > { %v2934_v52 = vadd.f32 %v1042_v6, %v927_v13 }
 0x169   : > { %2273 = vmatmul.msk.bf16.gmra.mxu2 %vm798_vm2, %v2757_v19 }
 0x16b   : > { %v854_v30 = vpop.f32.mrf.mxu1  ;;  %2295 = vmatmul.msk.bf16.gmra.mxu0 %vm798_vm2, %v2837_v18 }
 0x16c   : > { %v930_v44 = vadd.f32 %v929_v34, %v854_v30  ;;  %v934_v55 = vpop.f32.mrf.mxu2  ;;  %2282 = vmatmul.msk.bf16.gmra.mxu3 %vm798_vm2, %v2718_v29 }
 0x16e   : > { %2262 = vmatmul.msk.bf16.gmra.mxu1 %vm798_vm2, %v2712_v26 }
 0x16f   : > { %v1045_v42 = vpop.f32.mrf.mxu3 }
 0x170   : > { %v2944_v56 = vadd.f32 %v1045_v42, %v930_v44 }
 0x173   : > { %v856_v11 = vpop.f32.mrf.mxu1 }
 0x174   : > { %v932_v21 = vadd.f32 %v931_v51, %v856_v11  ;;  %v936_v23 = vpop.f32.mrf.mxu2 }
 0x177   : > { %v1047_v50 = vpop.f32.mrf.mxu3 }
 0x178   : > { %v2946_v19 = vadd.f32 %v1047_v50, %v932_v21 }
 0x179   : > { %2274 = vmatmul.msk.bf16.gmra.mxu2 %vm798_vm2, %v2782_v54 }
 0x17b   : > { %v859_v10 = vpop.f32.mrf.mxu1  ;;  %2296 = vmatmul.msk.bf16.gmra.mxu0 %vm798_vm2, %v2866_v28 }
 0x17c   : > { %v935_v29 = vadd.f32 %v934_v55, %v859_v10  ;;  %v939_v58 = vpop.f32.mrf.mxu2  ;;  %2283 = vmatmul.msk.bf16.gmra.mxu3 %vm798_vm2, %v2748_v4 }
 0x17e   : > { %2263 = vmatmul.msk.bf16.gmra.mxu1 %vm798_vm2, %v2743_v57 }
 0x17f   : > { %v1050_v26 = vpop.f32.mrf.mxu3 }
 0x180   : > { %v2956_v8 = vadd.f32 %v1050_v26, %v935_v29 }
 0x183   : > { %v861_v15 = vpop.f32.mrf.mxu1 }
 0x184   : > { %v937_v5 = vadd.f32 %v936_v23, %v861_v15  ;;  %v941_v34 = vpop.f32.mrf.mxu2 }
 0x187   : > { %v1052_v20 = vpop.f32.mrf.mxu3 }
 0x188   : > { %v2958_v54 = vadd.f32 %v1052_v20, %v937_v5 }
 0x189   : > { %2275 = vmatmul.msk.bf16.gmra.mxu2 %vm798_vm2, %v2807_v40 }
 0x18b   : > { %v864_v46 = vpop.f32.mrf.mxu1  ;;  %2297 = vmatmul.msk.bf16.gmra.mxu0 %vm798_vm2, %v2899_v32 }
 0x18c   : > { %v940_v4 = vadd.f32 %v939_v58, %v864_v46  ;;  %v944_v38 = vpop.f32.mrf.mxu2  ;;  %2284 = vmatmul.msk.bf16.gmra.mxu3 %vm798_vm2, %v2773_v63 }
 0x18e   : > { %2264 = vmatmul.msk.bf16.gmra.mxu1 %vm798_vm2, %v2768_v36  ;;  %v839_v36 = vpop.f32.mrf.mxu0 }
 0x18f   : > { %v1055_v57 = vpop.f32.mrf.mxu3 }
 0x190   : > { %v2968_v13 = vadd.f32 %v1055_v57, %v940_v4 }
 0x193   : > { %v866_v51 = vpop.f32.mrf.mxu1 }
 0x194   : > { %v942_v6 = vadd.f32 %v941_v34, %v866_v51  ;;  %v946_v30 = vpop.f32.mrf.mxu2 }
 0x196   : > { %v841_v50 = vpop.f32.mrf.mxu0 }
 0x197   : > { %v1057_v44 = vpop.f32.mrf.mxu3 }
 0x198   : > { %v2970_v40 = vadd.f32 %v1057_v44, %v942_v6 }
 0x199   : > { %2276 = vmatmul.msk.bf16.gmra.mxu2 %vm798_vm2, %v2853_v45 }
 0x19b   : > { %v869_v32 = vpop.f32.mrf.mxu1  ;;  %2298 = vmatmul.msk.bf16.gmra.mxu0 %vm798_vm2, %v2914_v17 }
 0x19c   : > { %v945_v63 = vadd.f32 %v944_v38, %v869_v32  ;;  %v949_v55 = vpop.f32.mrf.mxu2  ;;  %2285 = vmatmul.msk.bf16.gmra.mxu3 %vm798_vm2, %v2798_v2 }
 0x19e   : > { %2265 = vmatmul.msk.bf16.gmra.mxu1 %vm798_vm2, %v2793_v16  ;;  %v914_v26 = vpop.f32.mrf.mxu0 }
 0x19f   : > { %v1060_v42 = vpop.f32.mrf.mxu3  ;;  %v915_v32 = vadd.f32 %v914_v26, %v839_v36 }
 0x1a0   : > { %v2980_v11 = vadd.f32 %v1060_v42, %v945_v63 }
 0x1a3   : > { %v871_v21 = vpop.f32.mrf.mxu1 }
 0x1a4   : > { %v2982_v23 = vadd.f32 %v946_v30, %v871_v21  ;;  %v951_v45 = vpop.f32.mrf.mxu2 }
 0x1a7   : > { %v2984_v10 = vpop.f32.mrf.mxu3 }
 0x1a9   : > { %2277 = vmatmul.msk.bf16.gmra.mxu2 %vm798_vm2, %v2878_v61  ;;  %v916_v61 = vpop.f32.mrf.mxu0 }
 0x1ab   : > { %v874_v17 = vpop.f32.mrf.mxu1 }
 0x1ac   : > { %v950_v29 = vadd.f32 %v949_v55, %v874_v17  ;;  %v954_v2 = vpop.f32.mrf.mxu2  ;;  %2286 = vmatmul.msk.bf16.gmra.mxu3 %vm798_vm2, %v2837_v18 }
 0x1ae   : > { %2266 = vmatmul.msk.bf16.gmra.mxu1 %vm798_vm2, %v2832_v39  ;;  %v1880_v39 = vld [vmem:[%s3280_s6] sm:$0xf] }
 0x1af   : > { %v1065_v16 = vpop.f32.mrf.mxu3  ;;  %v1913_v57 = vsel %vm826_vm1, %v1880_v39, 0 }
 0x1b0   : > { %v2992_v58 = vadd.f32 %v1065_v16, %v950_v29  ;;  %1922 = vmatpush.bf16.msra.mxu3 %v1913_v57 }
 0x1b1   : > { %v1030_v44 = vpop.f32.mrf.mxu0 }
 0x1b3   : > { %v876_v15 = vpop.f32.mrf.mxu1 }
 0x1b4   : > { %v2994_v5 = vadd.f32 %v951_v45, %v876_v15  ;;  %v956_v34 = vpop.f32.mrf.mxu2  ;;  %v917_v45 = vadd.f32 %v916_v61, %v841_v50 }
 0x1b7   : > { %v2996_v20 = vpop.f32.mrf.mxu3 }
 0x1b9   : > { %2278 = vmatmul.msk.bf16.gmra.mxu2 %vm798_vm2, %v2891_v47  ;;  %v1032_v21 = vpop.f32.mrf.mxu0 }
 0x1ba   : > { %v1076_v17 = vadd.f32 %v1032_v21, %v917_v45 }
 0x1bb   : > { %v879_v46 = vpop.f32.mrf.mxu1 }
 0x1bc   : > { %v955_v4 = vadd.f32 %v954_v2, %v879_v46  ;;  %v1275_v18 = vpop.f32.mrf.mxu2  ;;  %2287 = vmatmul.msk.bf16.gmra.mxu3 %vm798_vm2, %v2866_v28  ;;  %v1075_v28 = vadd.f32 %v1030_v44, %v915_v32 }
 0x1be   : > { %2267 = vmatmul.msk.bf16.gmra.mxu1 %vm798_vm2, %v2870_v25 }
 0x1bf   : > { %v1070_v38 = vpop.f32.mrf.mxu3 }
 0x1c0   : > { %v3008_v51 = vadd.f32 %v1070_v38, %v955_v4 }
 0x1c3   : > { %v881_v47 = vpop.f32.mrf.mxu1 }
 0x1c4   : > { %v3010_v6 = vadd.f32 %v956_v34, %v881_v47  ;;  %v1277_v30 = vpop.f32.mrf.mxu2 }
 0x1c9   : > { %2310 = vmatmul.msk.bf16.vlgmr.msra.gmra.mxu2 %vm798_vm2, %v2692_v48 }
 0x1cb   : > { %v1121_v25 = vpop.f32.mrf.mxu1 }
 0x1cc   : > { %v1166_v63 = vadd.f32 %v1121_v25, %v1075_v28  ;;  %v1280_v55 = vpop.f32.mrf.mxu2  ;;  %2288 = vmatmul.msk.bf16.gmra.mxu3 %vm798_vm2, %v2885_v14 }
 0x1ce   : > { %2268 = vmatmul.msk.bf16.gmra.mxu1 %vm798_vm2, %v2888_v12  ;;  %v3018_v42 = vadd.f32 %v1275_v18, %v1166_v63 }
 0x1d3   : > { %v1123_v29 = vpop.f32.mrf.mxu1 }
 0x1d4   : > { %v1167_v36 = vadd.f32 %v1123_v29, %v1076_v17  ;;  %v1282_v2 = vpop.f32.mrf.mxu2 }
 0x1d6   : > { %v3020_v16 = vadd.f32 %v1277_v30, %v1167_v36 }
 0x1d9   : > { %2311 = vmatmul.msk.bf16.gmra.mxu2 %vm798_vm2, %v2721_v0 }
 0x1db   : > { %v1126_v48 = vpop.f32.mrf.mxu1 }
 0x1dc   : > { %v1168_v26 = vadd.f32 %v1126_v48, %v2908_v33  ;;  %v1285_v14 = vpop.f32.mrf.mxu2 }
 0x1de   : > { %2300 = vmatmul.msk.bf16.vlgmr.msra.gmra.mxu1 %vm798_vm2, %v2703_v3  ;;  %v3027_v12 = vadd.f32 %v1280_v55, %v1168_v26 }
 0x1e3   : > { %v1128_v15 = vpop.f32.mrf.mxu1 }
 0x1e4   : > { %v1169_v50 = vadd.f32 %v1128_v15, %v2922_v60  ;;  %v1287_v34 = vpop.f32.mrf.mxu2  ;;  %v1490_v15 = vpop.f32.mrf.mxu0 }
 0x1e6   : > { %v3030_v61 = vadd.f32 %v1282_v2, %v1169_v50 }
 0x1e9   : > { %2312 = vmatmul.msk.bf16.gmra.mxu2 %vm798_vm2, %v2751_v7 }
 0x1eb   : > { %v1131_v46 = vpop.f32.mrf.mxu1 }
 0x1ec   : > { %v1170_v0 = vadd.f32 %v1131_v46, %v2932_v37  ;;  %v1290_v4 = vpop.f32.mrf.mxu2 }
 0x1ee   : > { %2301 = vmatmul.msk.bf16.gmra.mxu1 %vm798_vm2, %v2731_v41  ;;  %v3037_v33 = vadd.f32 %v1285_v14, %v1170_v0 }
 0x1f3   : > { %v1133_v3 = vpop.f32.mrf.mxu1 }
 0x1f4   : > { %v1171_v18 = vadd.f32 %v1133_v3, %v2934_v52  ;;  %v1292_v39 = vpop.f32.mrf.mxu2 }
 0x1f6   : > { %v3040_v60 = vadd.f32 %v1287_v34, %v1171_v18  ;;  %v3284_v34 = vld [vmem:[#allocation2_spill] sm:$0xff] }
 0x1f9   : > { %2313 = vmatmul.msk.bf16.gmra.mxu2 %vm798_vm2, %v2776_v43 }
 0x1fb   : > { %v1136_v38 = vpop.f32.mrf.mxu1 }
 0x1fc   : > { %v1172_v7 = vadd.f32 %v1136_v38, %v2944_v56  ;;  %v1295_v57 = vpop.f32.mrf.mxu2 }
 0x1fe   : > { %2302 = vmatmul.msk.bf16.gmra.mxu1 %vm798_vm2, %v2761_v22  ;;  %v3047_v37 = vadd.f32 %v1290_v4, %v1172_v7 }
 0x203   : > { %v1138_v41 = vpop.f32.mrf.mxu1 }
 0x204   : > { %v1173_v47 = vadd.f32 %v1138_v41, %v2946_v19  ;;  %v1297_v30 = vpop.f32.mrf.mxu2 }
 0x206   : > { %v3050_v52 = vadd.f32 %v1292_v39, %v1173_v47 }
 0x209   : > { %2314 = vmatmul.msk.bf16.gmra.mxu2 %vm798_vm2, %v2801_v27 }
 0x20b   : > { %v1141_v44 = vpop.f32.mrf.mxu1 }
 0x20c   : > { %v1174_v43 = vadd.f32 %v1141_v44, %v2956_v8  ;;  %v1300_v32 = vpop.f32.mrf.mxu2 }
 0x20e   : > { %2303 = vmatmul.msk.bf16.gmra.mxu1 %vm798_vm2, %v2786_v59  ;;  %v3057_v56 = vadd.f32 %v1295_v57, %v1174_v43 }
 0x213   : > { %v1143_v22 = vpop.f32.mrf.mxu1 }
 0x214   : > { %v1175_v28 = vadd.f32 %v1143_v22, %v2958_v54  ;;  %v1302_v25 = vpop.f32.mrf.mxu2  ;;  %v1072_v54 = vpop.f32.mrf.mxu3 }
 0x216   : > { %v3060_v19 = vadd.f32 %v1297_v30, %v1175_v28 }
 0x219   : > { %2315 = vmatmul.msk.bf16.gmra.mxu2 %vm798_vm2, %v2840_v24 }
 0x21b   : > { %v1146_v63 = vpop.f32.mrf.mxu1 }
 0x21c   : > { %v1176_v27 = vadd.f32 %v1146_v63, %v2968_v13  ;;  %v1305_v55 = vpop.f32.mrf.mxu2  ;;  %v1399_v36 = vpop.f32.mrf.mxu3 }
 0x21e   : > { %2304 = vmatmul.msk.bf16.gmra.mxu1 %vm798_vm2, %v2811_v35  ;;  %v3067_v8 = vadd.f32 %v1300_v32, %v1176_v27 }
 0x223   : > { %v1148_v59 = vpop.f32.mrf.mxu1 }
 0x224   : > { %v1177_v21 = vadd.f32 %v1148_v59, %v2970_v40  ;;  %v1307_v45 = vpop.f32.mrf.mxu2  ;;  %v1088_v40 = vadd.f32 %v2984_v10, %v2982_v23  ;;  %v1492_v23 = vpop.f32.mrf.mxu0  ;;  %v1090_v10 = vadd.f32 %v2996_v20, %v2994_v5  ;;  %v1092_v5 = vadd.f32 %v1072_v54, %v3010_v6 }
 0x226   : > { %v3070_v17 = vadd.f32 %v1302_v25, %v1177_v21 }
 0x229   : > { %2316 = vmatmul.msk.bf16.gmra.mxu2 %vm798_vm2, %v2873_v9  ;;  %v1401_v9 = vpop.f32.mrf.mxu3 }
 0x22a   : > { %v1445_v25 = vadd.f32 %v1401_v9, %v3020_v16 }
 0x22b   : > { %v1151_v24 = vpop.f32.mrf.mxu1 }
 0x22c   : > { %v1178_v29 = vadd.f32 %v1151_v24, %v2980_v11  ;;  %v1310_v13 = vpop.f32.mrf.mxu2  ;;  %v1536_v59 = vadd.f32 %v1492_v23, %v1445_v25 }
 0x22e   : > { %2305 = vmatmul.msk.bf16.gmra.mxu1 %vm798_vm2, %v2857_v49  ;;  %v3077_v35 = vadd.f32 %v1305_v55, %v1178_v29  ;;  %v3111_v55 = vld [vmem:[%s3279_s5] ss:$0 sm:$0xff] }
 0x231   : > { %v1404_v4 = vpop.f32.mrf.mxu3 }
 0x232   : > { %v1446_v16 = vadd.f32 %v1404_v4, %v3027_v12 }
 0x233   : > { %v1153_v2 = vpop.f32.mrf.mxu1 }
 0x234   : > { %v1179_v48 = vadd.f32 %v1153_v2, %v1088_v40  ;;  %v1312_v26 = vpop.f32.mrf.mxu2 }
 0x236   : > { %v3081_v14 = vadd.f32 %v1307_v45, %v1179_v48 }
 0x239   : > { %2317 = vmatmul.msk.bf16.gmra.mxu2 %vm798_vm2, %v2902_v53  ;;  %v1495_v53 = vpop.f32.mrf.mxu0  ;;  %v1406_v57 = vpop.f32.mrf.mxu3 }
 0x23a   : > { %v1447_v9 = vadd.f32 %v1406_v57, %v3030_v61 }
 0x23b   : > { %v1156_v11 = vpop.f32.mrf.mxu1 }
 0x23c   : > { %v1180_v50 = vadd.f32 %v1156_v11, %v2992_v58  ;;  %v1315_v49 = vpop.f32.mrf.mxu2 }
 0x23e   : > { %2306 = vmatmul.msk.bf16.gmra.mxu1 %vm798_vm2, %v3284_v34  ;;  %v3088_v46 = vadd.f32 %v1310_v13, %v1180_v50 }
 0x241   : > { %v1497_v44 = vpop.f32.mrf.mxu0  ;;  %v1409_v32 = vpop.f32.mrf.mxu3 }
 0x243   : > { %v1158_v0 = vpop.f32.mrf.mxu1 }
 0x244   : > { %v1181_v3 = vadd.f32 %v1158_v0, %v1090_v10  ;;  %v1317_v18 = vpop.f32.mrf.mxu2 }
 0x246   : > { %v3092_v39 = vadd.f32 %v1312_v26, %v1181_v3  ;;  %v1537_v26 = vadd.f32 %v1495_v53, %v1446_v16 }
 0x249   : > { %2318 = vmatmul.msk.bf16.gmra.mxu2 %vm798_vm2, %v2917_v62  ;;  %v1444_v62 = vadd.f32 %v1399_v36, %v3018_v42  ;;  %v1411_v6 = vpop.f32.mrf.mxu3 }
 0x24b   : > { %v1161_v58 = vpop.f32.mrf.mxu1 }
 0x24c   : > { %v1182_v38 = vadd.f32 %v1161_v58, %v3008_v51  ;;  %v1768_v7 = vpop.f32.mrf.mxu2  ;;  %v1535_v51 = vadd.f32 %v1490_v15, %v1444_v62 }
 0x24e   : > { %2307 = vmatmul.msk.bf16.gmra.mxu1 %vm798_vm2, %v2911_v31  ;;  %v3099_v41 = vadd.f32 %v1315_v49, %v1182_v38  ;;  %v1500_v31 = vpop.f32.mrf.mxu0  ;;  %v1538_v49 = vadd.f32 %v1497_v44, %v1447_v9 }
 0x251   : > { %v1414_v2 = vpop.f32.mrf.mxu3 }
 0x253   : > { %v1163_v20 = vpop.f32.mrf.mxu1 }
 0x254   : > { %v1183_v47 = vadd.f32 %v1163_v20, %v1092_v5  ;;  %v1770_v30 = vpop.f32.mrf.mxu2 }
 0x256   : > { %v3102_v43 = vadd.f32 %v1317_v18, %v1183_v47  ;;  %v1448_v18 = vadd.f32 %v1409_v32, %v3037_v33  ;;  %v1449_v47 = vadd.f32 %v1411_v6, %v3040_v60 }
 0x258   : > { %v1539_v57 = vadd.f32 %v1500_v31, %v1448_v18 }
 0x259   : > { %v1416_v0 = vpop.f32.mrf.mxu3 }
 0x25b   : > { %v1644_v22 = vpop.f32.mrf.mxu1 }
 0x25c   : > { %v1773_v28 = vpop.f32.mrf.mxu2  ;;  %v1689_v63 = vadd.f32 %v1644_v22, %v1535_v51 }
 0x25e   : > { %2308 = vmatmul.msk.bf16.gmra.mxu1 %vm798_vm2, %v2920_v1  ;;  %v1813_v27 = vadd.f32 %v1768_v7, %v1689_v63  ;;  %v1502_v1 = vpop.f32.mrf.mxu0 }
 0x25f   : > { %v1540_v22 = vadd.f32 %v1502_v1, %v1449_v47 }
 0x260   : > { %v1835_v54 = vadd.f32 %v3111_v55, %v1813_v27  ;;  %v1450_v27 = vadd.f32 %v1414_v2, %v3047_v37 }
 0x261   : > { %v1419_v44 = vpop.f32.mrf.mxu3 }
 0x262   : > { %v1853_v13 = vmax.f32 %v1835_v54, 0.0 }
 0x263   : > { %v1646_v42 = vpop.f32.mrf.mxu1 }
 0x264   : > { %v1690_v21 = vadd.f32 %v1646_v42, %v1536_v59  ;;  %v1775_v45 = vpop.f32.mrf.mxu2 }
 0x266   : > { %v1814_v24 = vadd.f32 %v1770_v30, %v1690_v21  ;;  %v1505_v34 = vpop.f32.mrf.mxu0 }
 0x268   : > { %v1836_v29 = vadd.f32 %v3111_v55, %v1814_v24  ;;  %v1451_v24 = vadd.f32 %v1416_v0, %v3050_v52 }
 0x269   : > { %v1421_v59 = vpop.f32.mrf.mxu3 }
 0x26a   : > { %v1854_v36 = vmax.f32 %v1836_v29, 0.0 }
 0x26b   : > { %v1649_v40 = vpop.f32.mrf.mxu1 }
 0x26c   : > { %v1871_v48 = vpack.c.bf16 %v1854_v36, %v1853_v13  ;;  %v1778_v15 = vpop.f32.mrf.mxu2  ;;  %v1691_v11 = vadd.f32 %v1649_v40, %v1537_v26 }
 0x26e   : > { %2319 = vmatmul.msk.bf16.vlgmr.msra.gmra.mxu3 %vm798_vm2, %v1871_v48  ;;  %v1815_v50 = vadd.f32 %v1773_v28, %v1691_v11  ;;  %v1507_v20 = vpop.f32.mrf.mxu0 }
 0x26f   : > { %v1542_v13 = vadd.f32 %v1507_v20, %v1451_v24 }
 0x270   : > { %v1837_v4 = vadd.f32 %v3111_v55, %v1815_v50 }
 0x271   : > { %v1424_v40 = vpop.f32.mrf.mxu3 }
 0x272   : > { %v1855_v58 = vmax.f32 %v1837_v4, 0.0 }
 0x273   : > { %v1651_v23 = vpop.f32.mrf.mxu1 }
 0x274   : > { %v1692_v12 = vadd.f32 %v1651_v23, %v1538_v49  ;;  %v1780_v10 = vpop.f32.mrf.mxu2 }
 0x276   : > { %v1816_v3 = vadd.f32 %v1775_v45, %v1692_v12  ;;  %v1510_v63 = vpop.f32.mrf.mxu0  ;;  %v1541_v45 = vadd.f32 %v1505_v34, %v1450_v27  ;;  %v1453_v12 = vadd.f32 %v1421_v59, %v3060_v19 }
 0x278   : > { %v1838_v53 = vadd.f32 %v3111_v55, %v1816_v3 }
 0x27a   : > { %v1856_v38 = vmax.f32 %v1838_v53, 0.0 }
 0x27b   : > { %v1654_v61 = vpop.f32.mrf.mxu1 }
 0x27c   : > { %v1872_v7 = vpack.c.bf16 %v1856_v38, %v1855_v58  ;;  %v1783_v5 = vpop.f32.mrf.mxu2  ;;  %v1693_v30 = vadd.f32 %v1654_v61, %v1539_v57 }
 0x27e   : > { %2320 = vmatmul.msk.bf16.gmra.mxu3 %vm798_vm2, %v1872_v7  ;;  %v1817_v62 = vadd.f32 %v1778_v15, %v1693_v30  ;;  %v1512_v29 = vpop.f32.mrf.mxu0  ;;  %v1452_v15 = vadd.f32 %v1419_v44, %v3057_v56  ;;  %v1454_v7 = vadd.f32 %v1424_v40, %v3067_v8 }
 0x27f   : > { %v1544_v18 = vadd.f32 %v1512_v29, %v1453_v12 }
 0x280   : > { %v1839_v32 = vadd.f32 %v3111_v55, %v1817_v62  ;;  %v1543_v23 = vadd.f32 %v1510_v63, %v1452_v15 }
 0x282   : > { %v1857_v42 = vmax.f32 %v1839_v32, 0.0 }
 0x283   : > { %v1656_v51 = vpop.f32.mrf.mxu1 }
 0x284   : > { %v1694_v28 = vadd.f32 %v1656_v51, %v1540_v22  ;;  %v1785_v33 = vpop.f32.mrf.mxu2 }
 0x286   : > { %v1818_v25 = vadd.f32 %v1780_v10, %v1694_v28  ;;  %v1515_v52 = vpop.f32.mrf.mxu0  ;;  %v1426_v10 = vpop.f32.mrf.mxu3 }
 0x287   : > { %v1545_v62 = vadd.f32 %v1515_v52, %v1454_v7  ;;  %v1455_v22 = vadd.f32 %v1426_v10, %v3070_v17  ;;  %v2386_v10 = vld [vmem:[%s2542_s24 + $0x10] sm:$0xff] }
 0x288   : > { %v1840_v31 = vadd.f32 %v3111_v55, %v1818_v25 }
 0x28a   : > { %v1858_v60 = vmax.f32 %v1840_v31, 0.0 }
 0x28b   : > { %v1659_v6 = vpop.f32.mrf.mxu1 }
 0x28c   : > { %v1873_v21 = vpack.c.bf16 %v1858_v60, %v1857_v42  ;;  %v1788_v54 = vpop.f32.mrf.mxu2  ;;  %v1695_v16 = vadd.f32 %v1659_v6, %v1541_v45 }
 0x28e   : > { %2321 = vmatmul.msk.bf16.gmra.mxu3 %vm798_vm2, %v1873_v21  ;;  %v1819_v1 = vadd.f32 %v1783_v5, %v1695_v16  ;;  %v1517_v56 = vpop.f32.mrf.mxu0  ;;  %v1429_v57 = vpop.f32.mrf.mxu3 }
 0x28f   : > { %v1546_v25 = vadd.f32 %v1517_v56, %v1455_v22  ;;  %v1456_v42 = vadd.f32 %v1429_v57, %v3077_v35 }
 0x290   : > { %v1841_v48 = vadd.f32 %v3111_v55, %v1819_v1 }
 0x292   : > { %v1859_v11 = vmax.f32 %v1841_v48, 0.0 }
 0x293   : > { %v1661_v36 = vpop.f32.mrf.mxu1 }
 0x294   : > { %v1696_v37 = vadd.f32 %v1661_v36, %v1542_v13  ;;  %v1790_v2 = vpop.f32.mrf.mxu2 }
 0x296   : > { %v1820_v26 = vadd.f32 %v1785_v33, %v1696_v37  ;;  %v1520_v28 = vpop.f32.mrf.mxu0  ;;  %v1431_v33 = vpop.f32.mrf.mxu3 }
 0x297   : > { %v1547_v16 = vadd.f32 %v1520_v28, %v1456_v42  ;;  %v1457_v1 = vadd.f32 %v1431_v33, %v3081_v14 }
 0x298   : > { %v1842_v9 = vadd.f32 %v3111_v55, %v1820_v26 }
 0x29a   : > { %v1860_v50 = vmax.f32 %v1842_v9, 0.0 }
 0x29b   : > { %v1664_v49 = vpop.f32.mrf.mxu1 }
 0x29c   : > { %v1874_v34 = vpack.c.bf16 %v1860_v50, %v1859_v11  ;;  %v1697_v0 = vadd.f32 %v1664_v49, %v1543_v23  ;;  %v1793_v4 = vpop.f32.mrf.mxu2 }
 0x29e   : > { %2322 = vmatmul.msk.bf16.gmra.mxu3 %vm798_vm2, %v1874_v34  ;;  %v1821_v3 = vadd.f32 %v1788_v54, %v1697_v0  ;;  %v1522_v6 = vpop.f32.mrf.mxu0  ;;  %v1434_v54 = vpop.f32.mrf.mxu3  ;;  %v1989_v0 = vrot.slane %v2386_v10, 3 }
 0x29f   : > { %v1548_v40 = vadd.f32 %v1522_v6, %v1457_v1  ;;  %v1458_v11 = vadd.f32 %v1434_v54, %v3088_v46  ;;  %v2390_v54 = vld [vmem:[%s2542_s24 + $0x30] sm:$0xff] }
 0x2a0   : > { %v1843_v38 = vadd.f32 %v3111_v55, %v1821_v3 }
 0x2a2   : > { %v1861_v19 = vmax.f32 %v1843_v38, 0.0 }
 0x2a3   : > { %v1666_v53 = vpop.f32.mrf.mxu1 }
 0x2a4   : > { %v1698_v58 = vadd.f32 %v1666_v53, %v1544_v18  ;;  %v1795_v20 = vpop.f32.mrf.mxu2 }
 0x2a6   : > { %v1822_v61 = vadd.f32 %v1790_v2, %v1698_v58  ;;  %v1525_v37 = vpop.f32.mrf.mxu0  ;;  %v1436_v48 = vpop.f32.mrf.mxu3 }
 0x2a7   : > { %v1549_v23 = vadd.f32 %v1525_v37, %v1458_v11  ;;  %v1459_v18 = vadd.f32 %v1436_v48, %v3092_v39  ;;  %v2391_v37 = vld [vmem:[%s2542_s24 + $0x38] sm:$0xff] }
 0x2a8   : > { %v1844_v5 = vadd.f32 %v3111_v55, %v1822_v61 }
 0x2aa   : > { %v1862_v47 = vmax.f32 %v1844_v5, 0.0  ;;  %v2388_v5 = vld [vmem:[%s2542_s24 + $0x20] sm:$0xff] }
 0x2ab   : > { %v1669_v30 = vpop.f32.mrf.mxu1 }
 0x2ac   : > { %v1875_v44 = vpack.c.bf16 %v1862_v47, %v1861_v19  ;;  %v1699_v51 = vadd.f32 %v1669_v30, %v1545_v62  ;;  %v1798_v63 = vpop.f32.mrf.mxu2 }
 0x2ae   : > { %2323 = vmatmul.msk.bf16.gmra.mxu3 %vm798_vm2, %v1875_v44  ;;  %v1823_v32 = vadd.f32 %v1793_v4, %v1699_v51  ;;  %v1527_v12 = vpop.f32.mrf.mxu0  ;;  %v2387_v4 = vld [vmem:[%s2542_s24 + $0x18] sm:$0xff]  ;;  %v1439_v58 = vpop.f32.mrf.mxu3 }
 0x2af   : > { %v1990_v3 = vrot.slane %v2387_v4, 3  ;;  %v1550_v38 = vadd.f32 %v1527_v12, %v1459_v18  ;;  %v1460_v39 = vadd.f32 %v1439_v58, %v3099_v41 }
 0x2b0   : > { %v1845_v31 = vadd.f32 %v3111_v55, %v1823_v32 }
 0x2b1   : > { %v1991_v61 = vsel %vm1709_vm7, %v1989_v0, %v1990_v3 }
 0x2b2   : > { %v1863_v21 = vmax.f32 %v1845_v31, 0.0 }
 0x2b3   : > { %v1671_v8 = vpop.f32.mrf.mxu1 }
 0x2b4   : > { %v1700_v27 = vadd.f32 %v1671_v8, %v1546_v25  ;;  %v1800_v29 = vpop.f32.mrf.mxu2  ;;  %v2389_v8 = vld [vmem:[%s2542_s24 + $0x28] sm:$0xff] }
 0x2b6   : > { %v1824_v59 = vadd.f32 %v1795_v20, %v1700_v27  ;;  %v1992_v20 = vrot.slane %v2388_v5, 3  ;;  %v1530_v30 = vpop.f32.mrf.mxu0  ;;  %v1441_v62 = vpop.f32.mrf.mxu3  ;;  %v1994_v27 = vrot.slane %v2389_v8, 3 }
 0x2b7   : > { %v1461_v31 = vadd.f32 %v1441_v62, %v3102_v43 }
 0x2b8   : > { %v1846_v60 = vadd.f32 %v3111_v55, %v1824_v59  ;;  %v1993_v28 = vsel %vm1709_vm7, %v1990_v3, %v1992_v20  ;;  %v1995_v6 = vsel %vm1709_vm7, %v1992_v20, %v1994_v27 }
 0x2ba   : > { %v1864_v17 = vmax.f32 %v1846_v60, 0.0 }
 0x2bb   : > { %v1674_v45 = vpop.f32.mrf.mxu1 }
 0x2bc   : > { %v1876_v24 = vpack.c.bf16 %v1864_v17, %v1863_v21  ;;  %v1701_v13 = vadd.f32 %v1674_v45, %v1547_v16  ;;  %v1803_v9 = vpop.f32.mrf.mxu2 }
 0x2be   : > { %2324 = vmatmul.msk.bf16.gmra.mxu3 %vm798_vm2, %v1876_v24  ;;  %v1825_v36 = vadd.f32 %v1798_v63, %v1701_v13  ;;  %v1551_v63 = vadd.f32 %v1530_v30, %v1460_v39  ;;  %v1532_v41 = vpop.f32.mrf.mxu0  ;;  %v1996_v24 = vrot.slane %v2390_v54, 3 }
 0x2bf   : > { %v1552_v60 = vadd.f32 %v1532_v41, %v1461_v31 }
 0x2c0   : > { %v1847_v26 = vadd.f32 %v3111_v55, %v1825_v36  ;;  %v1997_v36 = vsel %vm1709_vm7, %v1994_v27, %v1996_v24 }
 0x2c2   : > { %v1865_v14 = vmax.f32 %v1847_v26, 0.0 }
 0x2c3   : > { %v1676_v35 = vpop.f32.mrf.mxu1 }
 0x2c4   : > { %v1702_v2 = vadd.f32 %v1676_v35, %v1548_v40  ;;  %v1805_v46 = vpop.f32.mrf.mxu2  ;;  %v1998_v35 = vrot.slane %v2391_v37, 3 }
 0x2c6   : > { %v1826_v15 = vadd.f32 %v1800_v29, %v1702_v2  ;;  %v3171_v2 = vld [vmem:[%s3281_s7] ss:$0 sm:$0xff]  ;;  %v1999_v26 = vsel %vm1709_vm7, %v1996_v24, %v1998_v35  ;;  %v2399_v24 = vld [vmem:[%s2542_s24 + $0x78] sm:$0xff] }
 0x2c8   : > { %v1848_v50 = vadd.f32 %v3111_v55, %v1826_v15 }
 0x2ca   : > { %v1866_v52 = vmax.f32 %v1848_v50, 0.0 }
 0x2cb   : > { %v1679_v49 = vpop.f32.mrf.mxu1 }
 0x2cc   : > { %v1877_v34 = vpack.c.bf16 %v1866_v52, %v1865_v14  ;;  %v1703_v53 = vadd.f32 %v1679_v49, %v1549_v23  ;;  %v1808_v33 = vpop.f32.mrf.mxu2  ;;  %v2393_v23 = vld [vmem:[%s2542_s24 + $0x48] sm:$0xff] }
 0x2cd   : > { %v2002_v12 = vrot.slane %v2393_v23, 3  ;;  %v2402_v23 = vld [vmem:[%s2542_s24 + $0x90] sm:$0xff] }
 0x2ce   : > { %2325 = vmatmul.msk.bf16.gmra.mxu3 %vm798_vm2, %v1877_v34  ;;  %v1827_v56 = vadd.f32 %v1803_v9, %v1703_v53  ;;  %v2392_v9 = vld [vmem:[%s2542_s24 + $0x40] sm:$0xff]  ;;  %v2394_v53 = vld [vmem:[%s2542_s24 + $0x50] sm:$0xff] }
 0x2cf   : > { %v2000_v11 = vrot.slane %v2392_v9, 3  ;;  %v2004_v58 = vrot.slane %v2394_v53, 3  ;;  %v2401_v9 = vld [vmem:[%s2542_s24 + $0x88] sm:$0xff]  ;;  %v2403_v53 = vld [vmem:[%s2542_s24 + $0x98] sm:$0xff] }
 0x2d0   : > { %v1849_v19 = vadd.f32 %v3111_v55, %v1827_v56 }
 0x2d1   : > { %v2001_v49 = vsel %vm1709_vm7, %v1998_v35, %v2000_v11  ;;  %v2003_v3 = vsel %vm1709_vm7, %v2000_v11, %v2002_v12  ;;  %v2018_v11 = vrot.slane %v2401_v9, 3 }
 0x2d2   : > { %v1867_v22 = vmax.f32 %v1849_v19, 0.0 }
 0x2d3   : > { %v1681_v7 = vpop.f32.mrf.mxu1 }
 0x2d4   : > { %v1704_v57 = vadd.f32 %v1681_v7, %v1550_v38  ;;  %v1810_v45 = vpop.f32.mrf.mxu2 }
 0x2d6   : > { %v1828_v47 = vadd.f32 %v1805_v46, %v1704_v57  ;;  %v2395_v57 = vld [vmem:[%s2542_s24 + $0x58] sm:$0xff] }
 0x2d7   : > { %v2006_v5 = vrot.slane %v2395_v57, 3  ;;  %v2404_v57 = vld [vmem:[%s2542_s24 + $0xa0] sm:$0xff] }
 0x2d8   : > { %v1850_v44 = vadd.f32 %v3111_v55, %v1828_v47 }
 0x2d9   : > { %v2007_v30 = vsel %vm1709_vm7, %v2004_v58, %v2006_v5 }
 0x2da   : > { %v1868_v51 = vmax.f32 %v1850_v44, 0.0  ;;  %v2396_v44 = vld [vmem:[%s2542_s24 + $0x60] sm:$0xff] }
 0x2db   : > { %v1684_v32 = vpop.f32.mrf.mxu1  ;;  %v2008_v62 = vrot.slane %v2396_v44, 3 }
 0x2dc   : > { %v1878_v25 = vpack.c.bf16 %v1868_v51, %v1867_v22  ;;  %v1705_v59 = vadd.f32 %v1684_v32, %v1551_v63 }
 0x2de   : > { %2326 = vmatmul.msk.bf16.gmra.mxu3 %vm798_vm2, %v1878_v25  ;;  %v1829_v42 = vadd.f32 %v1808_v33, %v1705_v59  ;;  %v2009_v33 = vsel %vm1709_vm7, %v2006_v5, %v2008_v62  ;;  %v2397_v25 = vld [vmem:[%s2542_s24 + $0x68] sm:$0xff]  ;;  %v2024_v5 = vrot.slane %v2404_v57, 3 }
 0x2df   : > { %v2010_v63 = vrot.slane %v2397_v25, 3 }
 0x2e0   : > { %v1851_v16 = vadd.f32 %v3111_v55, %v1829_v42  ;;  %v2398_v42 = vld [vmem:[%s2542_s24 + $0x70] sm:$0xff] }
 0x2e1   : > { %v2011_v59 = vsel %vm1709_vm7, %v2008_v62, %v2010_v63 }
 0x2e2   : > { %v1869_v1 = vmax.f32 %v1851_v16, 0.0  ;;  %v2014_v16 = vrot.slane %v2399_v24, 3 }
 0x2e3   : > { %v1686_v21 = vpop.f32.mrf.mxu1 }
 0x2e4   : > { %v1706_v17 = vadd.f32 %v1686_v21, %v1552_v60  ;;  %v2012_v60 = vrot.slane %v2398_v42, 3 }
 0x2e6   : > { %v1830_v29 = vadd.f32 %v1810_v45, %v1706_v17  ;;  %v2013_v45 = vsel %vm1709_vm7, %v2010_v63, %v2012_v60 }
 0x2e8   : > { %v1852_v43 = vadd.f32 %v3111_v55, %v1830_v29 }
 0x2ea   : > { %v1870_v13 = vmax.f32 %v1852_v43, 0.0 }
 0x2ec   : > { %v1879_v40 = vpack.c.bf16 %v1870_v13, %v1869_v1  ;;  %v2015_v13 = vsel %vm1709_vm7, %v2012_v60, %v2014_v16 }
 0x2ee   : > { %2327 = vmatmul.msk.bf16.gmra.mxu3 %vm798_vm2, %v1879_v40  ;;  %v2400_v40 = vld [vmem:[%s2542_s24 + $0x80] sm:$0xff] }
 0x2ef   : > { %v2016_v37 = vrot.slane %v2400_v40, 3 }
 0x2f1   : > { %v1924_v55 = vpop.f32.mrf.mxu3 }
 0x2f2   : > { %v1925_v48 = vadd.f32 %v3171_v2, %v1924_v55 }
 0x2f4   : > { %v2044_v15 = vadd.f32 %v1991_v61, %v1925_v48  ;;  %v2005_v61 = vsel %vm1709_vm7, %v2002_v12, %v2004_v58  ;;  %v2020_v12 = vrot.slane %v2402_v23, 3  ;;  %v2022_v58 = vrot.slane %v2403_v53, 3 }
 0x2f6   : > { %v2062_v50 = vmax.f32 %v2044_v15, 0.0 }
 0x2f8   : > { %2080 = vst.msk [vmem:[%s3178_s12] sm:$0xff] %vm413_vm0, %v2062_v50 }
 0x2f9   : > { %v1926_v14 = vpop.f32.mrf.mxu3 }
 0x2fa   : > { %v1927_v52 = vadd.f32 %v3171_v2, %v1926_v14 }
 0x2fc   : > { %v2045_v34 = vadd.f32 %v1993_v28, %v1927_v52 }
 0x2fe   : > { %v2063_v10 = vmax.f32 %v2045_v34, 0.0 }
 0x300   : > { %2081 = vst.msk [vmem:[%s3178_s12 + $0x8] sm:$0xff] %vm413_vm0, %v2063_v10 }
 0x301   : > { %v1929_v0 = vpop.f32.mrf.mxu3 }
 0x302   : > { %v1930_v4 = vadd.f32 %v3171_v2, %v1929_v0 }
 0x304   : > { %v2046_v18 = vadd.f32 %v1995_v6, %v1930_v4 }
 0x306   : > { %v2064_v46 = vmax.f32 %v2046_v18, 0.0 }
 0x308   : > { %2082 = vst.msk [vmem:[%s3178_s12 + $0x10] sm:$0xff] %vm413_vm0, %v2064_v46 }
 0x309   : > { %v1931_v56 = vpop.f32.mrf.mxu3 }
 0x30a   : > { %v1932_v38 = vadd.f32 %v3171_v2, %v1931_v56 }
 0x30c   : > { %v2047_v7 = vadd.f32 %v1997_v36, %v1932_v38 }
 0x30e   : > { %v2065_v20 = vmax.f32 %v2047_v7, 0.0 }
 0x310   : > { %2083 = vst.msk [vmem:[%s3178_s12 + $0x18] sm:$0xff] %vm413_vm0, %v2065_v20 }
 0x311   : > { %v1934_v19 = vpop.f32.mrf.mxu3 }
 0x312   : > { %v1935_v47 = vadd.f32 %v3171_v2, %v1934_v19 }
 0x314   : > { %v2048_v39 = vadd.f32 %v1999_v26, %v1935_v47  ;;  %v2017_v26 = vsel %vm1709_vm7, %v2014_v16, %v2016_v37 }
 0x316   : > { %v2066_v22 = vmax.f32 %v2048_v39, 0.0 }
 0x318   : > { %2084 = vst.msk [vmem:[%s3178_s12 + $0x20] sm:$0xff] %vm413_vm0, %v2066_v22 }
 0x319   : > { %v1936_v51 = vpop.f32.mrf.mxu3 }
 0x31a   : > { %v1937_v28 = vadd.f32 %v3171_v2, %v1936_v51 }
 0x31c   : > { %v2049_v32 = vadd.f32 %v2001_v49, %v1937_v28  ;;  %v2019_v49 = vsel %vm1709_vm7, %v2016_v37, %v2018_v11 }
 0x31e   : > { %v2067_v8 = vmax.f32 %v2049_v32, 0.0 }
 0x320   : > { %2085 = vst.msk [vmem:[%s3178_s12 + $0x28] sm:$0xff] %vm413_vm0, %v2067_v8 }
 0x321   : > { %v1939_v27 = vpop.f32.mrf.mxu3 }
 0x322   : > { %v1940_v31 = vadd.f32 %v3171_v2, %v1939_v27 }
 0x324   : > { %v2050_v41 = vadd.f32 %v2003_v3, %v1940_v31  ;;  %v2021_v3 = vsel %vm1709_vm7, %v2018_v11, %v2020_v12 }
 0x326   : > { %v2068_v6 = vmax.f32 %v2050_v41, 0.0 }
 0x328   : > { %2086 = vst.msk [vmem:[%s3178_s12 + $0x30] sm:$0xff] %vm413_vm0, %v2068_v6 }
 0x329   : > { %v1941_v21 = vpop.f32.mrf.mxu3 }
 0x32a   : > { %v1942_v17 = vadd.f32 %v3171_v2, %v1941_v21 }
 0x32c   : > { %v2051_v54 = vadd.f32 %v2005_v61, %v1942_v17  ;;  %v2023_v61 = vsel %vm1709_vm7, %v2020_v12, %v2022_v58 }
 0x32e   : > { %v2069_v29 = vmax.f32 %v2051_v54, 0.0 }
 0x330   : > { %2087 = vst.msk [vmem:[%s3178_s12 + $0x38] sm:$0xff] %vm413_vm0, %v2069_v29 }
 0x331   : > { %v1944_v43 = vpop.f32.mrf.mxu3 }
 0x332   : > { %v1945_v1 = vadd.f32 %v3171_v2, %v1944_v43 }
 0x334   : > { %v2052_v36 = vadd.f32 %v2007_v30, %v1945_v1  ;;  %v2025_v30 = vsel %vm1709_vm7, %v2022_v58, %v2024_v5 }
 0x336   : > { %v2070_v35 = vmax.f32 %v2052_v36, 0.0 }
 0x338   : > { %2088 = vst.msk [vmem:[%s3178_s12 + $0x40] sm:$0xff] %vm413_vm0, %v2070_v35 }
 0x339   : > { %v1946_v55 = vpop.f32.mrf.mxu3 }
 0x33a   : > { %v1947_v48 = vadd.f32 %v3171_v2, %v1946_v55 }
 0x33c   : > { %v2053_v15 = vadd.f32 %v2009_v33, %v1947_v48 }
 0x33e   : > { %v2071_v50 = vmax.f32 %v2053_v15, 0.0 }
 0x340   : > { %2089 = vst.msk [vmem:[%s3178_s12 + $0x48] sm:$0xff] %vm413_vm0, %v2071_v50 }
 0x341   : > { %v1949_v14 = vpop.f32.mrf.mxu3 }
 0x342   : > { %v1950_v52 = vadd.f32 %v3171_v2, %v1949_v14 }
 0x344   : > { %v2054_v34 = vadd.f32 %v2011_v59, %v1950_v52 }
 0x346   : > { %v2072_v10 = vmax.f32 %v2054_v34, 0.0 }
 0x348   : > { %2090 = vst.msk [vmem:[%s3178_s12 + $0x50] sm:$0xff] %vm413_vm0, %v2072_v10 }
 0x349   : > { %v1951_v0 = vpop.f32.mrf.mxu3 }
 0x34a   : > { %v1952_v4 = vadd.f32 %v3171_v2, %v1951_v0 }
 0x34c   : > { %v2055_v18 = vadd.f32 %v2013_v45, %v1952_v4 }
 0x34e   : > { %v2073_v46 = vmax.f32 %v2055_v18, 0.0 }
 0x350   : > { %2091 = vst.msk [vmem:[%s3178_s12 + $0x58] sm:$0xff] %vm413_vm0, %v2073_v46 }
 0x351   : > { %v1954_v56 = vpop.f32.mrf.mxu3 }
 0x352   : > { %v1955_v38 = vadd.f32 %v3171_v2, %v1954_v56 }
 0x354   : > { %v2056_v7 = vadd.f32 %v2015_v13, %v1955_v38 }
 0x356   : > { %v2074_v20 = vmax.f32 %v2056_v7, 0.0 }
 0x358   : > { %2092 = vst.msk [vmem:[%s3178_s12 + $0x60] sm:$0xff] %vm413_vm0, %v2074_v20 }
 0x359   : > { %v1956_v19 = vpop.f32.mrf.mxu3 }
 0x35a   : > { %v1957_v47 = vadd.f32 %v3171_v2, %v1956_v19 }
 0x35c   : > { %v2057_v39 = vadd.f32 %v2017_v26, %v1957_v47 }
 0x35e   : > { %v2075_v44 = vmax.f32 %v2057_v39, 0.0 }
 0x360   : > { %2093 = vst.msk [vmem:[%s3178_s12 + $0x68] sm:$0xff] %vm413_vm0, %v2075_v44 }
 0x361   : > { %v1959_v62 = vpop.f32.mrf.mxu3 }
 0x362   : > { %v1960_v22 = vadd.f32 %v3171_v2, %v1959_v62 }
 0x364   : > { %v2058_v51 = vadd.f32 %v2019_v49, %v1960_v22 }
 0x366   : > { %v2076_v28 = vmax.f32 %v2058_v51, 0.0 }
 0x368   : > { %2094 = vst.msk [vmem:[%s3178_s12 + $0x70] sm:$0xff] %vm413_vm0, %v2076_v28 }
 0x369   : > { %v1961_v33 = vpop.f32.mrf.mxu3 }
 0x36a   : > { %v1962_v32 = vadd.f32 %v3171_v2, %v1961_v33 }
 0x36c   : > { %v2059_v25 = vadd.f32 %v2021_v3, %v1962_v32 }
 0x36e   : > { %v2077_v63 = vmax.f32 %v2059_v25, 0.0 }
 0x370   : > { %2095 = vst.msk [vmem:[%s3178_s12 + $0x78] sm:$0xff] %vm413_vm0, %v2077_v63 }
 0x371   : > { %v1964_v8 = vpop.f32.mrf.mxu3 }
 0x372   : > { %v1965_v27 = vadd.f32 %v3171_v2, %v1964_v8 }
 0x374   : > { %v2060_v31 = vadd.f32 %v2023_v61, %v1965_v27 }
 0x376   : > { %v2078_v59 = vmax.f32 %v2060_v31, 0.0 }
 0x378   : > { %2096 = vst.msk [vmem:[%s3178_s12 + $0x80] sm:$0xff] %vm413_vm0, %v2078_v59 }
 0x379   : > { %v1966_v41 = vpop.f32.mrf.mxu3 }
 0x37a   : > { %v1967_v42 = vadd.f32 %v3171_v2, %v1966_v41 }
 0x37c   : > { %v2061_v60 = vadd.f32 %v2025_v30, %v1967_v42 }
 0x37e   : > { %v2079_v6 = vmax.f32 %v2061_v60, 0.0 }
 0x380   : > { %2097 = vst.msk [vmem:[%s3178_s12 + $0x88] sm:$0xff] %vm413_vm0, %v2079_v6 }
 0x381 PF: > { %s18_s9 = sadd.s32 1, %s2443_s9   ;;  %s3285_s27 = smov %s2435_s29 }
 0x382   : > { %p15_p7 = scmp.ge.s32.totalorder %s18_s9, 6   ;;  %s3286_s28 = smov %s2439_s30 }
 0x383   : > { %s3287_s29 = smov %s3290_s10  ;;  %s3288_s30 = smov %s3294_s11 }
 0x384   :  { %17 = sbr.rel (!%p15_p7) target bundleno = 3 (0x3), region = 93 }

</bundles_post_ra>
